<compile_context>
chip_gen: v7x
topology: tpu7x:2x2x1
jax: 0.10.0
libtpu: 0.0.40
codegen_flags: <defaults>
</compile_context>

<pallas_src>
import jax
import jax.numpy as jnp
from jax.experimental import pallas as pl
from jax.experimental.pallas import tpu as pltpu

BN_EPS = 1e-5
LANE = 128
SUBLANE = 8


def _round_up(x, m):
    return (x + m - 1) // m * m


# --------------------------------------------------------------------------
# Pass 1: tiled matmul (bf16 -> f32 acc) + per-tile BN partial statistics
# --------------------------------------------------------------------------
def matmul_stats_kernel(a_ref, w_ref, y_ref, stats_ref):
    # a_ref:     (tile_m, Kp)  bf16 im2col patches
    # w_ref:     (Kp, Cp)      bf16 flattened conv weight (resident)
    # y_ref:     (tile_m, Cp)  bf16 pre-BN conv output
    # stats_ref: (8, Cp)       f32  row 0 = per-channel sum, row 1 = sum of sq
    y = jnp.dot(a_ref[...], w_ref[...], preferred_element_type=jnp.float32)
    y_ref[...] = y.astype(y_ref.dtype)

    col_sum = jnp.sum(y, axis=0, keepdims=True)       # (1, Cp) f32
    col_ssq = jnp.sum(y * y, axis=0, keepdims=True)   # (1, Cp) f32
    row = jax.lax.broadcasted_iota(jnp.int32, stats_ref.shape, 0)
    stats_ref[...] = (jnp.where(row == 0, col_sum, 0.0)
                      + jnp.where(row == 1, col_ssq, 0.0))


def _conv_matmul_stats(patches, w_mat, tile_m, compiler_params):
    Mp, Kp = patches.shape
    Cp = w_mat.shape[1]
    nt = Mp // tile_m
    return pl.pallas_call(
        matmul_stats_kernel,
        out_shape=(jax.ShapeDtypeStruct((Mp, Cp), jnp.bfloat16),
                   jax.ShapeDtypeStruct((nt * SUBLANE, Cp), jnp.float32)),
        grid=(nt,),
        in_specs=[
            pl.BlockSpec((tile_m, Kp), lambda i: (i, 0)),
            pl.BlockSpec((Kp, Cp), lambda i: (0, 0)),   # weight stays resident
        ],
        out_specs=(
            pl.BlockSpec((tile_m, Cp), lambda i: (i, 0)),
            pl.BlockSpec((SUBLANE, Cp), lambda i: (i, 0)),
        ),
        compiler_params=compiler_params,
    )(patches, w_mat)


# --------------------------------------------------------------------------
# Pass 2: tiled BatchNorm affine + ReLU
# --------------------------------------------------------------------------
def bn_relu_kernel(y_ref, scale_ref, shift_ref, o_ref):
    y = y_ref[...].astype(jnp.float32)
    o = y * scale_ref[...] + shift_ref[...]
    o_ref[...] = jnp.maximum(o, 0.0).astype(o_ref.dtype)


def _bn_relu_apply(y, scale, shift, tile_m, out_dtype, compiler_params):
    Mp, Cp = y.shape
    nt = Mp // tile_m
    return pl.pallas_call(
        bn_relu_kernel,
        out_shape=jax.ShapeDtypeStruct((Mp, Cp), out_dtype),
        grid=(nt,),
        in_specs=[
            pl.BlockSpec((tile_m, Cp), lambda i: (i, 0)),
            pl.BlockSpec((1, Cp), lambda i: (0, 0)),
            pl.BlockSpec((1, Cp), lambda i: (0, 0)),
        ],
        out_specs=pl.BlockSpec((tile_m, Cp), lambda i: (i, 0)),
        compiler_params=compiler_params,
    )(y, scale, shift)


# --------------------------------------------------------------------------
# JAX glue: im2col (gather/reshape only) + layout plumbing
# --------------------------------------------------------------------------
def im2col_3x3_same(x_nhwc):
    """(N, H, W, C) -> (N*H*W, 9*C), column order (dy, dx, ci)."""
    N, H, W, C = x_nhwc.shape
    xp = jnp.pad(x_nhwc, ((0, 0), (1, 1), (1, 1), (0, 0)))
    cols = [xp[:, dy:dy + H, dx:dx + W, :] for dy in range(3) for dx in range(3)]
    return jnp.concatenate(cols, axis=-1).reshape(N * H * W, 9 * C)


def conv_bn_relu_layer(h_nhwc, w_hwio, gamma, beta, *, out_dtype, tile_m=512):
    N, H, W, Cin = h_nhwc.shape
    Cout = w_hwio.shape[-1]
    M = N * H * W
    K = 9 * Cin
    Kp = _round_up(K, LANE)
    Cp = _round_up(Cout, LANE)

    tm = min(tile_m, _round_up(M, SUBLANE))
    tm = _round_up(tm, SUBLANE)
    Mp = _round_up(M, tm)
    nt = Mp // tm

    # bf16 patches halve the HBM traffic of the 9x-inflated im2col matrix and
    # feed the MXU at full rate; accumulation stays f32 inside the kernel.
    patches = im2col_3x3_same(h_nhwc.astype(jnp.bfloat16))
    patches = jnp.pad(patches, ((0, Mp - M), (0, Kp - K)))

    w_mat = w_hwio.astype(jnp.bfloat16).reshape(K, Cout)
    w_mat = jnp.pad(w_mat, ((0, Kp - K), (0, Cp - Cout)))

    cparams = pltpu.CompilerParams(
        dimension_semantics=("parallel",),      # megacore sharding on v7x
        vmem_limit_bytes=64 * 1024 * 1024,      # explicit, fits v7x's 64 MiB
    )

    y, stats = _conv_matmul_stats(patches, w_mat, tm, cparams)

    # Reduce per-tile partial stats (tiny, (Cout,)-sized math in f32).
    stats = stats.reshape(nt, SUBLANE, Cp)
    total = jnp.sum(stats[:, 0, :Cout], axis=0)
    total_sq = jnp.sum(stats[:, 1, :Cout], axis=0)
    mu = total / M
    var = jnp.maximum(total_sq / M - mu * mu, 0.0)   # clamp vs. cancellation
    inv_std = jax.lax.rsqrt(var + BN_EPS)
    scale = gamma * inv_std
    shift = beta - mu * scale
    scale_p = jnp.pad(scale, (0, Cp - Cout)).reshape(1, Cp).astype(jnp.float32)
    shift_p = jnp.pad(shift, (0, Cp - Cout)).reshape(1, Cp).astype(jnp.float32)

    out = _bn_relu_apply(y, scale_p, shift_p, tm, out_dtype, cparams)
    return out[:M, :Cout].reshape(N, H, W, Cout)


def unet_convblock(x_nchw, params, tile_m=512):
    """params = [(w_hwio, gamma, beta), (w_hwio, gamma, beta)]"""
    h = jnp.transpose(x_nchw, (0, 2, 3, 1))  # NCHW -> NHWC
    n_layers = len(params)
    for li, (w_hwio, gamma, beta) in enumerate(params):
        last = li == n_layers - 1
        h = conv_bn_relu_layer(
            h, w_hwio, gamma, beta,
            out_dtype=jnp.float32 if last else jnp.bfloat16,  # bf16 inter-layer
            tile_m=tile_m)
    return jnp.transpose(h, (0, 3, 1, 2))  # NHWC -> NCHW


# --------------------------------------------------------------------------
# Pure-JAX f32 reference (matches PyTorch training-mode forward)
# --------------------------------------------------------------------------
def reference_forward(x_nchw, params):
    h = x_nchw
    for w_hwio, gamma, beta in params:
        w_oihw = jnp.transpose(w_hwio, (3, 2, 0, 1))
        h = jax.lax.conv_general_dilated(
            h, w_oihw, window_strides=(1, 1), padding="SAME",
            dimension_numbers=("NCHW", "OIHW", "NCHW"))
        mu = jnp.mean(h, axis=(0, 2, 3), keepdims=True)
        var = jnp.mean((h - mu) ** 2, axis=(0, 2, 3), keepdims=True)
        h = (h - mu) * jax.lax.rsqrt(var + BN_EPS)
        h = h * gamma.reshape(1, -1, 1, 1) + beta.reshape(1, -1, 1, 1)
        h = jnp.maximum(h, 0.0)
    return h


if __name__ == "__main__":
    N, Cin, Cout, H, W = 2, 4, 8, 16, 16

    key = jax.random.PRNGKey(0)
    kx, kw1, kw2, kg1, kb1, kg2, kb2 = jax.random.split(key, 7)

    x = jax.random.normal(kx, (N, Cin, H, W), dtype=jnp.float32)

    # Conv weights in HWIO (Conv2d(in, out, 3, padding=1, bias=False))
    w1 = jax.random.normal(kw1, (3, 3, Cin, Cout), dtype=jnp.float32) * 0.2
    w2 = jax.random.normal(kw2, (3, 3, Cout, Cout), dtype=jnp.float32) * 0.2
    # BatchNorm affine params (deterministic, non-trivial)
    g1 = 1.0 + 0.1 * jax.random.normal(kg1, (Cout,), dtype=jnp.float32)
    b1 = 0.1 * jax.random.normal(kb1, (Cout,), dtype=jnp.float32)
    g2 = 1.0 + 0.1 * jax.random.normal(kg2, (Cout,), dtype=jnp.float32)
    b2 = 0.1 * jax.random.normal(kb2, (Cout,), dtype=jnp.float32)

    params = [(w1, g1, b1), (w2, g2, b2)]

    # tile_m=128 here so the test exercises the multi-tile grid and the
    # cross-tile BN stats reduction (M = 512 -> 4 tiles per layer).
    fwd = jax.jit(lambda xx, pp: unet_convblock(xx, pp, tile_m=128))
    out = jax.block_until_ready(fwd(x, params))
    assert out.shape == (N, Cout, H, W), out.shape

    ref = reference_forward(x, params)
    # Tolerance reflects bf16 MXU operands / bf16 intermediates (f32 accum).
    assert jnp.allclose(out, ref, rtol=3e-2, atol=3e-2), (
        float(jnp.max(jnp.abs(out - ref))))

    print("KERNEL_OK")
</pallas_src>

<mosaic_0001>
module attributes {stable_mosaic.version = 11 : i64} {
  func.func @matmul_stats_kernel(%arg0: i32, %arg1: memref<128x128xbf16, #tpu.memory_space<vmem>>, %arg2: memref<128x128xbf16, #tpu.memory_space<vmem>>, %arg3: memref<128x128xbf16, #tpu.memory_space<vmem>>, %arg4: memref<8x128xf32, #tpu.memory_space<vmem>>) attributes {dimension_semantics = [#tpu.dimension_semantics<parallel>], iteration_bounds = array<i64: 4>, scalar_prefetch = 0 : i64, scratch_operands = 0 : i64, tpu.core_type = #tpu.core_type<tc>, window_params = [{transform_indices = @transform_0, window_bounds = array<i64: 128, 128>}, {pipeline_mode = #tpu.pipeline_mode<synchronous>, transform_indices = @transform_1, window_bounds = array<i64: 128, 128>}, {transform_indices = @transform_2, window_bounds = array<i64: 128, 128>}, {transform_indices = @transform_3, window_bounds = array<i64: 8, 128>}]} {
    %c0 = arith.constant 0 : index
    %c0_0 = arith.constant 0 : index
    %0 = vector.load %arg1[%c0, %c0_0] : memref<128x128xbf16, #tpu.memory_space<vmem>>, vector<128x128xbf16>
    %c0_1 = arith.constant 0 : index
    %c0_2 = arith.constant 0 : index
    %1 = vector.load %arg2[%c0_1, %c0_2] : memref<128x128xbf16, #tpu.memory_space<vmem>>, vector<128x128xbf16>
    %cst = arith.constant dense<0.000000e+00> : vector<128x128xf32>
    %2 = tpu.matmul %0, %1, %cst {dimension_numbers = #tpu.dot_dimension_numbers<[1], [0], [0], [1], [0, 0, 1, 1], [], []>} : vector<128x128xbf16>, vector<128x128xbf16>, vector<128x128xf32> -> vector<128x128xf32>
    %3 = arith.truncf %2 : vector<128x128xf32> to vector<128x128xbf16>
    %c0_3 = arith.constant 0 : index
    %c0_4 = arith.constant 0 : index
    %4 = vector.load %arg3[%c0_3, %c0_4] : memref<128x128xbf16, #tpu.memory_space<vmem>>, vector<128x128xbf16>
    tpu.vector_store %arg3[%c0_3, %c0_4], %3 {strides = array<i32>} : memref<128x128xbf16, #tpu.memory_space<vmem>>, vector<128x128xbf16>,
    %cst_5 = arith.constant dense<0.000000e+00> : vector<128xf32>
    %5 = vector.multi_reduction <add>, %2, %cst_5 [0] : vector<128x128xf32> to vector<128xf32>
    %6 = vector.shape_cast %5 : vector<128xf32> to vector<1x128xf32>
    %7 = arith.mulf %2, %2 : vector<128x128xf32>
    %cst_6 = arith.constant dense<0.000000e+00> : vector<128xf32>
    %8 = vector.multi_reduction <add>, %7, %cst_6 [0] : vector<128x128xf32> to vector<128xf32>
    %9 = vector.shape_cast %8 : vector<128xf32> to vector<1x128xf32>
    %10 = tpu.iota {dimensions = array<i32: 0>} : vector<8x128xi32>
    %c0_i32 = arith.constant 0 : i32
    %11 = vector.broadcast %c0_i32 : i32 to vector<8x128xi32>
    %12 = arith.cmpi eq, %10, %11 : vector<8x128xi32>
    %cst_7 = arith.constant 0.000000e+00 : f32
    %13 = vector.shape_cast %6 : vector<1x128xf32> to vector<1x128xf32>
    %14 = vector.broadcast %13 : vector<1x128xf32> to vector<8x128xf32>
    %15 = vector.broadcast %cst_7 : f32 to vector<8x128xf32>
    %16 = arith.select %12, %14, %15 : vector<8x128xi1>, vector<8x128xf32>
    %c1_i32 = arith.constant 1 : i32
    %17 = vector.broadcast %c1_i32 : i32 to vector<8x128xi32>
    %18 = arith.cmpi eq, %10, %17 : vector<8x128xi32>
    %cst_8 = arith.constant 0.000000e+00 : f32
    %19 = vector.shape_cast %9 : vector<1x128xf32> to vector<1x128xf32>
    %20 = vector.broadcast %19 : vector<1x128xf32> to vector<8x128xf32>
    %21 = vector.broadcast %cst_8 : f32 to vector<8x128xf32>
    %22 = arith.select %18, %20, %21 : vector<8x128xi1>, vector<8x128xf32>
    %23 = arith.addf %16, %22 : vector<8x128xf32>
    %c0_9 = arith.constant 0 : index
    %c0_10 = arith.constant 0 : index
    %24 = vector.load %arg4[%c0_9, %c0_10] : memref<8x128xf32, #tpu.memory_space<vmem>>, vector<8x128xf32>
    tpu.vector_store %arg4[%c0_9, %c0_10], %23 {strides = array<i32>} : memref<8x128xf32, #tpu.memory_space<vmem>>, vector<8x128xf32>,
    return
  }
  func.func @transform_0(%arg0: i32) -> (i32, i32) {
    %c0_i32 = arith.constant 0 : i32
    %c0_i32_0 = arith.constant 0 : i32
    return %arg0, %c0_i32 : i32, i32
  }
  func.func @transform_1(%arg0: i32) -> (i32, i32) {
    %c0_i32 = arith.constant 0 : i32
    %c0_i32_0 = arith.constant 0 : i32
    %c0_i32_1 = arith.constant 0 : i32
    return %c0_i32, %c0_i32_0 : i32, i32
  }
  func.func @transform_2(%arg0: i32) -> (i32, i32) {
    %c0_i32 = arith.constant 0 : i32
    %c0_i32_0 = arith.constant 0 : i32
    return %arg0, %c0_i32 : i32, i32
  }
  func.func @transform_3(%arg0: i32) -> (i32, i32) {
    %c0_i32 = arith.constant 0 : i32
    %c0_i32_0 = arith.constant 0 : i32
    return %arg0, %c0_i32 : i32, i32
  }
}

module attributes {stable_mosaic.version = 11 : i64} {
  func.func @bn_relu_kernel(%arg0: i32, %arg1: memref<128x128xbf16, #tpu.memory_space<vmem>>, %arg2: memref<1x128xf32, #tpu.memory_space<vmem>>, %arg3: memref<1x128xf32, #tpu.memory_space<vmem>>, %arg4: memref<128x128xbf16, #tpu.memory_space<vmem>>) attributes {dimension_semantics = [#tpu.dimension_semantics<parallel>], iteration_bounds = array<i64: 4>, scalar_prefetch = 0 : i64, scratch_operands = 0 : i64, tpu.core_type = #tpu.core_type<tc>, window_params = [{transform_indices = @transform_0, window_bounds = array<i64: 128, 128>}, {pipeline_mode = #tpu.pipeline_mode<synchronous>, transform_indices = @transform_1, window_bounds = array<i64: 1, 128>}, {pipeline_mode = #tpu.pipeline_mode<synchronous>, transform_indices = @transform_2, window_bounds = array<i64: 1, 128>}, {transform_indices = @transform_3, window_bounds = array<i64: 128, 128>}]} {
    %c0 = arith.constant 0 : index
    %c0_0 = arith.constant 0 : index
    %0 = vector.load %arg1[%c0, %c0_0] : memref<128x128xbf16, #tpu.memory_space<vmem>>, vector<128x128xbf16>
    %1 = arith.extf %0 : vector<128x128xbf16> to vector<128x128xf32>
    %c0_1 = arith.constant 0 : index
    %c0_2 = arith.constant 0 : index
    %2 = vector.load %arg2[%c0_1, %c0_2] : memref<1x128xf32, #tpu.memory_space<vmem>>, vector<1x128xf32>
    %3 = vector.broadcast %2 : vector<1x128xf32> to vector<128x128xf32>
    %4 = arith.mulf %1, %3 : vector<128x128xf32>
    %c0_3 = arith.constant 0 : index
    %c0_4 = arith.constant 0 : index
    %5 = vector.load %arg3[%c0_3, %c0_4] : memref<1x128xf32, #tpu.memory_space<vmem>>, vector<1x128xf32>
    %6 = vector.broadcast %5 : vector<1x128xf32> to vector<128x128xf32>
    %7 = arith.addf %4, %6 : vector<128x128xf32>
    %cst = arith.constant 0.000000e+00 : f32
    %8 = vector.broadcast %cst : f32 to vector<128x128xf32>
    %9 = arith.maximumf %7, %8 : vector<128x128xf32>
    %10 = arith.truncf %9 : vector<128x128xf32> to vector<128x128xbf16>
    %c0_5 = arith.constant 0 : index
    %c0_6 = arith.constant 0 : index
    %11 = vector.load %arg4[%c0_5, %c0_6] : memref<128x128xbf16, #tpu.memory_space<vmem>>, vector<128x128xbf16>
    tpu.vector_store %arg4[%c0_5, %c0_6], %10 {strides = array<i32>} : memref<128x128xbf16, #tpu.memory_space<vmem>>, vector<128x128xbf16>,
    return
  }
  func.func @transform_0(%arg0: i32) -> (i32, i32) {
    %c0_i32 = arith.constant 0 : i32
    %c0_i32_0 = arith.constant 0 : i32
    return %arg0, %c0_i32 : i32, i32
  }
  func.func @transform_1(%arg0: i32) -> (i32, i32) {
    %c0_i32 = arith.constant 0 : i32
    %c0_i32_0 = arith.constant 0 : i32
    %c0_i32_1 = arith.constant 0 : i32
    return %c0_i32, %c0_i32_0 : i32, i32
  }
  func.func @transform_2(%arg0: i32) -> (i32, i32) {
    %c0_i32 = arith.constant 0 : i32
    %c0_i32_0 = arith.constant 0 : i32
    %c0_i32_1 = arith.constant 0 : i32
    return %c0_i32, %c0_i32_0 : i32, i32
  }
  func.func @transform_3(%arg0: i32) -> (i32, i32) {
    %c0_i32 = arith.constant 0 : i32
    %c0_i32_0 = arith.constant 0 : i32
    return %arg0, %c0_i32 : i32, i32
  }
}

module attributes {stable_mosaic.version = 11 : i64} {
  func.func @bn_relu_kernel(%arg0: i32, %arg1: memref<128x128xbf16, #tpu.memory_space<vmem>>, %arg2: memref<1x128xf32, #tpu.memory_space<vmem>>, %arg3: memref<1x128xf32, #tpu.memory_space<vmem>>, %arg4: memref<128x128xf32, #tpu.memory_space<vmem>>) attributes {dimension_semantics = [#tpu.dimension_semantics<parallel>], iteration_bounds = array<i64: 4>, scalar_prefetch = 0 : i64, scratch_operands = 0 : i64, tpu.core_type = #tpu.core_type<tc>, window_params = [{transform_indices = @transform_0, window_bounds = array<i64: 128, 128>}, {pipeline_mode = #tpu.pipeline_mode<synchronous>, transform_indices = @transform_1, window_bounds = array<i64: 1, 128>}, {pipeline_mode = #tpu.pipeline_mode<synchronous>, transform_indices = @transform_2, window_bounds = array<i64: 1, 128>}, {transform_indices = @transform_3, window_bounds = array<i64: 128, 128>}]} {
    %c0 = arith.constant 0 : index
    %c0_0 = arith.constant 0 : index
    %0 = vector.load %arg1[%c0, %c0_0] : memref<128x128xbf16, #tpu.memory_space<vmem>>, vector<128x128xbf16>
    %1 = arith.extf %0 : vector<128x128xbf16> to vector<128x128xf32>
    %c0_1 = arith.constant 0 : index
    %c0_2 = arith.constant 0 : index
    %2 = vector.load %arg2[%c0_1, %c0_2] : memref<1x128xf32, #tpu.memory_space<vmem>>, vector<1x128xf32>
    %3 = vector.broadcast %2 : vector<1x128xf32> to vector<128x128xf32>
    %4 = arith.mulf %1, %3 : vector<128x128xf32>
    %c0_3 = arith.constant 0 : index
    %c0_4 = arith.constant 0 : index
    %5 = vector.load %arg3[%c0_3, %c0_4] : memref<1x128xf32, #tpu.memory_space<vmem>>, vector<1x128xf32>
    %6 = vector.broadcast %5 : vector<1x128xf32> to vector<128x128xf32>
    %7 = arith.addf %4, %6 : vector<128x128xf32>
    %cst = arith.constant 0.000000e+00 : f32
    %8 = vector.broadcast %cst : f32 to vector<128x128xf32>
    %9 = arith.maximumf %7, %8 : vector<128x128xf32>
    %c0_5 = arith.constant 0 : index
    %c0_6 = arith.constant 0 : index
    %10 = vector.load %arg4[%c0_5, %c0_6] : memref<128x128xf32, #tpu.memory_space<vmem>>, vector<128x128xf32>
    tpu.vector_store %arg4[%c0_5, %c0_6], %9 {strides = array<i32>} : memref<128x128xf32, #tpu.memory_space<vmem>>, vector<128x128xf32>,
    return
  }
  func.func @transform_0(%arg0: i32) -> (i32, i32) {
    %c0_i32 = arith.constant 0 : i32
    %c0_i32_0 = arith.constant 0 : i32
    return %arg0, %c0_i32 : i32, i32
  }
  func.func @transform_1(%arg0: i32) -> (i32, i32) {
    %c0_i32 = arith.constant 0 : i32
    %c0_i32_0 = arith.constant 0 : i32
    %c0_i32_1 = arith.constant 0 : i32
    return %c0_i32, %c0_i32_0 : i32, i32
  }
  func.func @transform_2(%arg0: i32) -> (i32, i32) {
    %c0_i32 = arith.constant 0 : i32
    %c0_i32_0 = arith.constant 0 : i32
    %c0_i32_1 = arith.constant 0 : i32
    return %c0_i32, %c0_i32_0 : i32, i32
  }
  func.func @transform_3(%arg0: i32) -> (i32, i32) {
    %c0_i32 = arith.constant 0 : i32
    %c0_i32_0 = arith.constant 0 : i32
    return %arg0, %c0_i32 : i32, i32
  }
}

</mosaic_0001>

<bundles_post_ra>
// kernel: _lambda_.5
= control target key start
LH: loop header
LB: loop body
LE: loop exit
PB: predicated region body
PF: predicated region fallthrough
CT: control target
= control target key end

     0   :  { %8 = vsyncpa [#allocation3], 0  ;;  %s1184_s0 = inlined_call_operand.hbm [shape: bf16[512,128], index: 0, kind: input, shape index: {}]   ;;  %s1185_s1 = inlined_call_operand.hbm [shape: f32[1,128], index: 1, kind: input, shape index: {}]   ;;  %s1186_s2 = inlined_call_operand.hbm [shape: f32[1,128], index: 2, kind: input, shape index: {}]   ;;  %s1187_s3 = inlined_call_operand.hbm [shape: bf16[512,128], index: 3, kind: output, shape index: {}]  }
   0x1   :  { %10 = vsyncpa [#allocation3 + $0x1], 0 }
   0x2   :  { %11 = vsyncpa [#allocation6], 0 }
   0x3   :  { %12 = vsyncpa [#allocation4], 0 }
   0x4   :  { %14 = vsyncpa [#allocation4 + $0x1], 0  ;;  %s893_s12 = smov 0   ;;  %s895_s13 = smov 0  }
   0x5   :  { %s897_s14 = smov 0   ;;  %s899_s15 = smov 0  }
   0x6 LB: > { %s914_s16 = sadd.s32 4294967295, %s863_s15   ;;  %s496_s17 = sadd.s32 4294967294, %s863_s15   ;;  %s863_s15 = sphi %s899_s15, %s1210_s15   ;;  %s859_s14 = sphi %s897_s14, %s1209_s14   ;;  %s855_s13 = sphi %s895_s13, %s1208_s13   ;;  %s851_s12 = sphi %s893_s12, %s1207_s12  }
   0x7   : > { %s918_s18 = sadd.s32 1, %s863_s15   ;;  %s27_s19 = sadd.s32 1, %s859_s14 }
   0x8   : > { %s24_s20 = ssub.s32 %s863_s15, %s918_s18  ;;  %p34_p0 = scmp.ne.s32.totalorder %s859_s14, %s855_s13 }
   0x9   : > { %p25_p1 = scmp.eq.s32.totalorder %s24_s20, 0  ;;  %p35_p2 = scmp.eq.s32.totalorder %s863_s15, 0 }
   0xa   : > { %p40_p3 = scmp.ne.s32.totalorder %s855_s13, %s851_s12  ;;  %p1188_p4 = scmp.eq.s32.totalorder %s914_s16, 0 }
   0xb   : > { %s930_s21 = scalar_select %p25_p1, %s859_s14, %s27_s19  }
   0xc   : > { %p932_p5 = por %p35_p2, %p34_p0  ;;  %p938_p6 = por %p1188_p4, %p40_p3 }
   0xd   : > { %p106_p7 = scmp.eq.s32.totalorder %s914_s16, 3  ;;  %p112_p8 = scmp.eq.s32.totalorder %s496_s17, 3 }
   0xe   : > { %s1194_s23 = scalar_select %p938_p6, 1, 0 }
   0xf   : > { %p497_p9 = scmp.ge.s32.totalorder %s863_s15, 1  ;;  %p119_p10 = scmp.lt.s32.totalorder %s863_s15, 5 }
  0x10   : > { %p945_p11 = por %p106_p7, %p34_p0  ;;  %p949_p12 = por %p112_p8, %p40_p3 }
  0x11   : > { %p953_p13 = pnand %p497_p9, %p119_p10  ;;  %s865_s27 = smov [#allocation5]  }
  0x12   : > { %s1195_s24 = scalar_select %p945_p11, 1, 0 }
  0x13   : > { %s1196_s25 = scalar_select %p949_p12, 1, 0 }
  0x14   : > { %s1197_s26 = scalar_select %p953_p13, 1, 0 }
  0x15   : > { %p648_p1 = pneg %p953_p13  ;;  %s132_s28 = sshll.u32 %s865_s27, 4  ;;  %s133_s28 = int_to_ptr.vmem [resolvable:$true] %s132_s28 }
  0x16   : > { %p665_p2 = scmp.lt.s32.totalorder %s863_s15, 4  ;;  %s866_s4 = smov [#allocation7]  }
  0x17   : > { %p962_p0 = pnand %p648_p1, %p1188_p4  ;;  %s143_s5 = sshll.u32 %s866_s4, 4  ;;  %s972_s5 = int_to_ptr.vmem [resolvable:$true] %s143_s5 }
  0x18   : > { %p968_p3 = pnand %p665_p2, %p932_p5  ;;  %s707_s8 = scalar_lea.hbm %s1185_s1, 16 }
  0x19   : > { %p708_p7 = scmp.ne.s32.totalorder %s1185_s1, %s707_s8  ;;  %p709_p8 = pneg %p962_p0 }
  0x1a   : > { %s1199_s30 = scalar_select %p968_p3, 1, 0 }
  0x1b   : > { %p710_p5 = pnand %p709_p8, %p708_p7  ;;  %p714_p10 = scmp.lt.u32.totalorder %s707_s8, %s1185_s1 }
  0x1d   : > { %p711_p9 = pneg %p710_p5 }
  0x1f   : > { %p716_p1 = pnand %p714_p10, %p711_p9 }
  0x21   : > { %719 = shalt.err (!%p716_p1)
}
  0x22   : > { %s720_s19 = scalar_lea.vmem %s133_s28, 16  ;;  %s727_s20 = scalar_lea.vmem %s133_s28, 32 }
  0x23   : > { %p721_p2 = scmp.ne.s32.totalorder %s133_s28, %s720_s19  ;;  %p728_p11 = scmp.lt.s32.totalorder %s133_s28, %s133_s28 }
  0x24   : > { %p729_p6 = scmp.lt.s32.totalorder %s727_s20, %s720_s19 }
  0x25   : > { %p723_p4 = pnand %p721_p2, %p709_p8 }
  0x26   : > { %p730_p13 = por %p729_p6, %p728_p11 }
  0x27   : > { %p724_p12 = pneg %p723_p4 }
  0x29   : > { %p731_p3 = pnand %p730_p13, %p724_p12 }
  0x2b   : > { %734 = shalt.err (!%p731_p3)
}
  0x2c   : > { %651 = dma.hbm_to_vmem [thread:$0]  (!%p962_p0), %s1185_s1, 16, %s133_s28, [#allocation6]  }
  0x2d   : > { %s154_s4 = sand.u32 1, %s859_s14   ;;  %s735_s8 = scalar_lea.hbm %s1186_s2, 16 }
  0x2e   : > { %p736_p4 = scmp.ne.s32.totalorder %s1186_s2, %s735_s8  ;;  %p742_p12 = scmp.lt.u32.totalorder %s735_s8, %s1186_s2 }
  0x30   : > { %p738_p6 = pnand %p736_p4, %p709_p8 }
  0x32   : > { %p739_p11 = pneg %p738_p6 }
  0x34   : > { %p744_p13 = pnand %p742_p12, %p739_p11 }
  0x36   : > { %747 = shalt.err (!%p744_p13)
}
  0x37   : > { %s748_s28 = scalar_lea.vmem %s972_s5, 16  ;;  %s755_s19 = scalar_lea.vmem %s972_s5, 32 }
  0x38   : > { %p749_p3 = scmp.ne.s32.totalorder %s972_s5, %s748_s28  ;;  %p756_p9 = scmp.lt.s32.totalorder %s972_s5, %s972_s5 }
  0x39   : > { %p757_p10 = scmp.lt.s32.totalorder %s755_s19, %s748_s28 }
  0x3a   : > { %p751_p7 = pnand %p749_p3, %p709_p8 }
  0x3b   : > { %p758_p1 = por %p757_p10, %p756_p9 }
  0x3c   : > { %p752_p5 = pneg %p751_p7 }
  0x3e   : > { %p759_p2 = pnand %p758_p1, %p752_p5 }
  0x40   : > { %762 = shalt.err (!%p759_p2)
}
  0x41   : > { %654 = dma.hbm_to_vmem [thread:$0]  (!%p962_p0), %s1186_s2, 16, %s972_s5, [#allocation6]  }
  0x42   : > { %s501_s27 = sshll.u32 %s154_s4, 6  ;;  %s532_s6 = sshll.u32 %s863_s15, 10 }
  0x43   : > { %s1027_s9 = scalar_lea.hbm %s1184_s0, %s532_s6  ;;  %s158_s29 = scalar_lea.vmem [#allocation2], %s501_s27 }
  0x44   : > { %s165_s10 = sshll.u32 %s158_s29, 4  ;;  %s1031_s11 = scalar_lea.sflag [#allocation3], %s154_s4  ;;  %s1029_s10 = int_to_ptr.vmem [resolvable:$true] %s165_s10 }
  0x45   : > { %s763_s17 = scalar_lea.hbm %s1027_s9, 1024  ;;  %p1200_p0 = scmp.ne.s32.totalorder %s1199_s30, 0 }
  0x46   : > { %p764_p8 = scmp.ne.s32.totalorder %s1027_s9, %s763_s17  ;;  %s768_s19 = scalar_lea.hbm %s1184_s0, 4096 }
  0x47   : > { %p765_p4 = pneg %p1200_p0  ;;  %p769_p12 = scmp.lt.u32.totalorder %s1027_s9, %s1184_s0 }
  0x48   : > { %p770_p13 = scmp.lt.u32.totalorder %s768_s19, %s763_s17  ;;  %p772_p7 = scmp.lt.u32.totalorder %s763_s17, %s1027_s9 }
  0x49   : > { %p766_p6 = pnand %p765_p4, %p764_p8 }
  0x4a   : > { %p771_p3 = por %p770_p13, %p769_p12 }
  0x4b   : > { %p767_p11 = pneg %p766_p6 }
  0x4c   : > { %p773_p5 = por %p772_p7, %p771_p3 }
  0x4e   : > { %p774_p9 = pnand %p773_p5, %p767_p11 }
  0x50   : > { %777 = shalt.err (!%p774_p9)
}
  0x51   : > { %s778_s4 = scalar_lea.vmem %s1029_s10, 1024  ;;  %s867_s27 = smov [#allocation2]  }
  0x52   : > { %p779_p10 = scmp.ne.s32.totalorder %s1029_s10, %s778_s4  ;;  %s783_s6 = sshll.u32 %s867_s27, 4  ;;  %s784_s6 = int_to_ptr.vmem [resolvable:$false] %s783_s6 }
  0x53   : > { %s785_s7 = scalar_lea.vmem %s784_s6, 2048  ;;  %p786_p8 = scmp.lt.s32.totalorder %s1029_s10, %s784_s6 }
  0x54   : > { %p781_p1 = pnand %p779_p10, %p765_p4  ;;  %p787_p6 = scmp.lt.s32.totalorder %s785_s7, %s778_s4 }
  0x56   : > { %p782_p2 = pneg %p781_p1  ;;  %p788_p12 = por %p787_p6, %p786_p8 }
  0x58   : > { %p789_p13 = pnand %p788_p12, %p782_p2 }
  0x5a   : > { %792 = shalt.err (!%p789_p13)
}
  0x5b   : > { %s868_s8 = smov 64   ;;  %s869_s29 = smov 4  }
  0x5c   : > { %658 = dma.hbm_to_vmem [thread:$0]  (!%p1200_p0), %s1027_s9, 1024, %s1029_s10, %s1031_s11, %s868_s8, %s868_s8, %s869_s29  }
  0x5d   : > { %p1201_p4 = scmp.ne.s32.totalorder %s1197_s26, 0 }
  0x5e   : > { %s1062_s17 = sand.u32 (!%p1201_p4), 1, %s855_s13   ;;  %p1202_p11 = scmp.ne.s32.totalorder (!%p1201_p4), %s1194_s23, 0 }
  0x5f   : > { %177 = sbr.rel (%p1201_p4) target bundleno = 143 (0x8f), region = 32  ;;  %s505_s5 = sshll.u32 (!%p1201_p4), %s1062_s17, 6 }
  0x60   : > { %s180_s28 = scalar_lea.sflag (!%p1201_p4), [#allocation3], %s1062_s17  ;;  %s1068_s19 = scalar_lea.vmem (!%p1201_p4), [#allocation2], %s505_s5 }
  0x66   : > { %838 = dma.done.wait (%p1202_p11), %s180_s28, 1024  }
  0x67   : > { %840 = vsyncadd (%p1202_p11), %s180_s28, 4294966272  ;;  %p1203_p0 = scmp.eq.s32.totalorder %s914_s16, 0 }
  0x69   : > { %842 = dma.done.wait (%p1203_p0), [#allocation6], 32   ;;  %p1204_p3 = pmov %p1203_p0 }
  0x6a   : > { %v551_v0 = vld [vmem:[%s1068_s19] sm:$0xff]   ;;  %v622_v4 = vld [vmem:[%s1068_s19 + $0x8] sm:$0xff]   ;;  %v623_v5 = vld [vmem:[%s1068_s19 + $0x10] sm:$0xff]   ;;  %s1108_s23 = scalar_lea.vmem [#allocation8], %s505_s5  ;;  %s549_s30 = sshll.u32 %s914_s16, 10 }
  0x6b   : > { %844 = vsyncadd (%p1204_p3), [#allocation6], 4294967264  ;;  %v1079_v1 = vld [vmem:[#allocation5] ss:$0 sm:$0xff]  ;;  %v552_v2 = vunpack.c.l.bf16 %v551_v0  ;;  %v553_v3 = vunpack.c.h.bf16 %v551_v0  ;;  %v624_v6 = vld [vmem:[%s1068_s19 + $0x18] sm:$0xff]   ;;  %v556_v8 = vunpack.c.l.bf16 %v622_v4  ;;  %v557_v9 = vunpack.c.h.bf16 %v622_v4  ;;  %s404_s26 = sshll.u32 %s1108_s23, 4  ;;  %s1138_s11 = scalar_lea.hbm %s1187_s3, %s549_s30  ;;  %s1132_s26 = int_to_ptr.vmem [resolvable:$true] %s404_s26 }
  0x6c   : > { %v1084_v7 = vld [vmem:[#allocation7] ss:$0 sm:$0xff]  ;;  %v560_v10 = vunpack.c.l.bf16 %v623_v5  ;;  %v561_v11 = vunpack.c.h.bf16 %v623_v5  ;;  %v564_v14 = vunpack.c.l.bf16 %v624_v6  ;;  %v565_v15 = vunpack.c.h.bf16 %v624_v6  ;;  %v626_v33 = vld [vmem:[%s1068_s19 + $0x28] sm:$0xff]   ;;  %v627_v38 = vld [vmem:[%s1068_s19 + $0x30] sm:$0xff]   ;;  %s391_s16 = scalar_lea.sflag [#allocation4], %s1062_s17  ;;  %s793_s20 = scalar_lea.vmem %s1132_s26, 1024 }
  0x6d   : > { %v255_v12 = vmul.f32 %v552_v2, %v1079_v1  ;;  %v256_v13 = vmul.f32 %v553_v3, %v1079_v1  ;;  %v257_v16 = vmul.f32 %v556_v8, %v1079_v1  ;;  %v258_v17 = vmul.f32 %v557_v9, %v1079_v1  ;;  %v625_v28 = vld [vmem:[%s1068_s19 + $0x20] sm:$0xff]   ;;  %v628_v43 = vld [vmem:[%s1068_s19 + $0x38] sm:$0xff]   ;;  %p794_p7 = scmp.ne.s32.totalorder %s1132_s26, %s793_s20  ;;  %p1205_p5 = scmp.ne.s32.totalorder %s1195_s24, 0 }
  0x6e   : > { %v259_v18 = vmul.f32 %v560_v10, %v1079_v1  ;;  %v260_v19 = vmul.f32 %v561_v11, %v1079_v1  ;;  %v261_v22 = vmul.f32 %v564_v14, %v1079_v1  ;;  %v262_v23 = vmul.f32 %v565_v15, %v1079_v1  ;;  %s870_s22 = smov [#allocation8]  }
  0x6f   : > { %v278_v20 = vadd.f32 %v1084_v7, %v255_v12  ;;  %v279_v21 = vadd.f32 %v1084_v7, %v256_v13  ;;  %v280_v24 = vadd.f32 %v1084_v7, %v257_v16  ;;  %v281_v25 = vadd.f32 %v1084_v7, %v258_v17  ;;  %p795_p9 = pnand %p794_p7, %p1205_p5  ;;  %s797_s4 = sshll.u32 %s870_s22, 4  ;;  %s798_s4 = int_to_ptr.vmem [resolvable:$false] %s797_s4 }
  0x70   : > { %v282_v26 = vadd.f32 %v1084_v7, %v259_v18  ;;  %v283_v27 = vadd.f32 %v1084_v7, %v260_v19  ;;  %v284_v31 = vadd.f32 %v1084_v7, %v261_v22  ;;  %v285_v32 = vadd.f32 %v1084_v7, %v262_v23  ;;  %s799_s27 = scalar_lea.vmem %s798_s4, 2048  ;;  %p800_p1 = scmp.lt.s32.totalorder %s1132_s26, %s798_s4 }
  0x71   : > { %v294_v29 = vmax.f32 %v278_v20, 0.0  ;;  %v295_v30 = vmax.f32 %v279_v21, 0.0  ;;  %v296_v34 = vmax.f32 %v280_v24, 0.0  ;;  %v297_v35 = vmax.f32 %v281_v25, 0.0  ;;  %p796_p10 = pneg %p795_p9  ;;  %p801_p2 = scmp.lt.s32.totalorder %s799_s27, %s793_s20 }
  0x72   : > { %v298_v36 = vmax.f32 %v282_v26, 0.0  ;;  %v299_v37 = vmax.f32 %v283_v27, 0.0  ;;  %v300_v40 = vmax.f32 %v284_v31, 0.0  ;;  %v301_v41 = vmax.f32 %v285_v32, 0.0 }
  0x73   : > { %v585_v39 = vpack.c.bf16 %v295_v30, %v294_v29  ;;  %v568_v42 = vunpack.c.l.bf16 %v625_v28  ;;  %v590_v44 = vpack.c.bf16 %v297_v35, %v296_v34  ;;  %v569_v46 = vunpack.c.h.bf16 %v625_v28  ;;  %p802_p8 = por %p801_p2, %p800_p1 }
  0x74   : > { %v595_v45 = vpack.c.bf16 %v299_v37, %v298_v36  ;;  %v572_v47 = vunpack.c.l.bf16 %v626_v33  ;;  %v600_v48 = vpack.c.bf16 %v301_v41, %v300_v40  ;;  %v573_v50 = vunpack.c.h.bf16 %v626_v33 }
  0x75   : > { %586 = vst [vmem:[%s1108_s23] sm:$0xff] %v585_v39   ;;  %v263_v49 = vmul.f32 %v568_v42, %v1079_v1  ;;  %v576_v51 = vunpack.c.l.bf16 %v627_v38  ;;  %629 = vst [vmem:[%s1108_s23 + $0x8] sm:$0xff] %v590_v44   ;;  %v264_v52 = vmul.f32 %v569_v46, %v1079_v1  ;;  %v577_v54 = vunpack.c.h.bf16 %v627_v38  ;;  %p803_p6 = pnand %p802_p8, %p796_p10 }
  0x76   : > { %630 = vst [vmem:[%s1108_s23 + $0x10] sm:$0xff] %v595_v45   ;;  %v265_v53 = vmul.f32 %v572_v47, %v1079_v1  ;;  %v580_v55 = vunpack.c.l.bf16 %v628_v43  ;;  %631 = vst [vmem:[%s1108_s23 + $0x18] sm:$0xff] %v600_v48   ;;  %v266_v57 = vmul.f32 %v573_v50, %v1079_v1  ;;  %v581_v59 = vunpack.c.h.bf16 %v628_v43 }
  0x77   : > { %v286_v56 = vadd.f32 %v1084_v7, %v263_v49  ;;  %v267_v58 = vmul.f32 %v576_v51, %v1079_v1  ;;  %v287_v60 = vadd.f32 %v1084_v7, %v264_v52  ;;  %v268_v62 = vmul.f32 %v577_v54, %v1079_v1 }
  0x78   : > { %v288_v61 = vadd.f32 %v1084_v7, %v265_v53  ;;  %v269_v63 = vmul.f32 %v580_v55, %v1079_v1  ;;  %v289_v2 = vadd.f32 %v1084_v7, %v266_v57  ;;  %v270_v4 = vmul.f32 %v581_v59, %v1079_v1 }
  0x79   : > { %v302_v0 = vmax.f32 %v286_v56, 0.0  ;;  %v290_v3 = vadd.f32 %v1084_v7, %v267_v58  ;;  %v303_v5 = vmax.f32 %v287_v60, 0.0  ;;  %v291_v8 = vadd.f32 %v1084_v7, %v268_v62 }
  0x7a   : > { %v304_v6 = vmax.f32 %v288_v61, 0.0  ;;  %v292_v9 = vadd.f32 %v1084_v7, %v269_v63  ;;  %v305_v10 = vmax.f32 %v289_v2, 0.0  ;;  %v293_v12 = vadd.f32 %v1084_v7, %v270_v4 }
  0x7b   : > { %v306_v11 = vmax.f32 %v290_v3, 0.0  ;;  %v605_v13 = vpack.c.bf16 %v303_v5, %v302_v0  ;;  %v307_v1 = vmax.f32 %v291_v8, 0.0 }
  0x7c   : > { %v308_v14 = vmax.f32 %v292_v9, 0.0  ;;  %v610_v15 = vpack.c.bf16 %v305_v10, %v304_v6  ;;  %v309_v16 = vmax.f32 %v293_v12, 0.0 }
  0x7d   : > { %632 = vst [vmem:[%s1108_s23 + $0x20] sm:$0xff] %v605_v13   ;;  %v615_v17 = vpack.c.bf16 %v307_v1, %v306_v11 }
  0x7e   : > { %633 = vst [vmem:[%s1108_s23 + $0x28] sm:$0xff] %v610_v15   ;;  %v620_v7 = vpack.c.bf16 %v309_v16, %v308_v14 }
  0x7f   : > { %634 = vst [vmem:[%s1108_s23 + $0x30] sm:$0xff] %v615_v17  }
  0x80   : > { %635 = vst [vmem:[%s1108_s23 + $0x38] sm:$0xff] %v620_v7  }
  0x81   : > { %806 = shalt.err (!%p803_p6)
}
  0x82   : > { %s807_s6 = scalar_lea.hbm %s1138_s11, 1024  ;;  %s811_s29 = scalar_lea.hbm %s1187_s3, 4096 }
  0x83   : > { %p808_p12 = scmp.ne.s32.totalorder %s1138_s11, %s807_s6  ;;  %p812_p11 = scmp.lt.u32.totalorder %s1138_s11, %s1187_s3 }
  0x84   : > { %p813_p0 = scmp.lt.u32.totalorder %s811_s29, %s807_s6  ;;  %p815_p7 = scmp.lt.u32.totalorder %s807_s6, %s1138_s11 }
  0x85   : > { %p809_p13 = pnand %p808_p12, %p1205_p5 }
  0x86   : > { %p814_p3 = por %p813_p0, %p812_p11 }
  0x87   : > { %p810_p4 = pneg %p809_p13 }
  0x88   : > { %p816_p9 = por %p815_p7, %p814_p3 }
  0x8a   : > { %p817_p10 = pnand %p816_p9, %p810_p4 }
  0x8c   : > { %820 = shalt.err (!%p817_p10)
}
  0x8d   : > { %s871_s19 = smov 64   ;;  %s872_s23 = smov 4  }
  0x8e   : > { %646 = dma.vmem_to_hbm [thread:$0]  (%p1205_p5), %s1132_s26, 1024, %s1138_s11, %s391_s16, %s871_s19, %s871_s19, %s872_s23  }
  0x8f PF: > { %p668_p1 = scmp.ge.s32.totalorder %s863_s15, 2  ;;  %s419_s30 = sand.u32 1, %s851_s12  }
  0x90   : > { %p1206_p2 = scmp.ne.s32.totalorder %s1196_s25, 0  ;;  %s420_s9 = scalar_lea.sflag [#allocation4], %s419_s30 }
  0x92   : > { %p660_p8 = pnand %p668_p1, %p1206_p2 }
  0x94   : > { %846 = dma.done.wait (!%p660_p8), %s420_s9, 1024  }
  0x95   : > { %848 = vsyncadd (!%p660_p8), %s420_s9, 4294966272  ;;  %p17_p6 = scmp.ge.s32.totalorder %s918_s18, 6   ;;  %s1207_s12 = smov %s855_s13 }
  0x96   : > { %s1208_s13 = smov %s859_s14  ;;  %s1209_s14 = smov %s930_s21 }
  0x97   : > { %s1210_s15 = smov %s918_s18  ;;  %19 = sbr.rel (!%p17_p6) target bundleno = 6 (0x6), region = 85 }
  0x9e   :  { %425 = vsyncpa [#allocation3], 1 }
  0x9f   :  { %427 = vsyncpa [#allocation3 + $0x1], 1 }
  0xa0   :  { %428 = vsyncpa [#allocation6], 1 }
  0xa1   :  { %429 = vsyncpa [#allocation4], 1 }
  0xa2   :  { %431 = vsyncpa [#allocation4 + $0x1], 1 }

// kernel: _lambda_.4
= control target key start
LH: loop header
LB: loop body
LE: loop exit
PB: predicated region body
PF: predicated region fallthrough
CT: control target
= control target key end

     0   :  { %9 = vsyncpa [#allocation3], 0  ;;  %s1490_s0 = inlined_call_operand.hbm [shape: bf16[512,128], index: 0, kind: input, shape index: {}]   ;;  %s1491_s1 = inlined_call_operand.hbm [shape: bf16[128,128], index: 1, kind: input, shape index: {}]   ;;  %s1492_s2 = inlined_call_operand.hbm [shape: bf16[512,128], index: 2, kind: output, shape index: {0}]   ;;  %s1493_s3 = inlined_call_operand.hbm [shape: f32[32,128], index: 3, kind: output, shape index: {1}]  }
   0x1   :  { %11 = vsyncpa [#allocation3 + $0x1], 0 }
   0x2   :  { %12 = vsyncpa [#allocation6], 0 }
   0x3   :  { %13 = vsyncpa [#allocation4], 0 }
   0x4   :  { %15 = vsyncpa [#allocation4 + $0x1], 0 }
   0x5   :  { %16 = vsyncpa [#allocation9], 0 }
   0x6   :  { %18 = vsyncpa [#allocation9 + $0x1], 0  ;;  %s1188_s12 = smov 0   ;;  %s1190_s13 = smov 0  }
   0x7   :  { %s1192_s14 = smov 0   ;;  %s1194_s15 = smov 0  }
   0x8 LB: > { %s1209_s16 = sadd.s32 4294967295, %s1158_s15   ;;  %s736_s17 = sadd.s32 4294967294, %s1158_s15   ;;  %s1158_s15 = sphi %s1194_s15, %s1512_s15   ;;  %s1154_s14 = sphi %s1192_s14, %s1511_s14   ;;  %s1150_s13 = sphi %s1190_s13, %s1510_s13   ;;  %s1146_s12 = sphi %s1188_s12, %s1509_s12  }
   0x9   : > { %p44_p0 = scmp.ne.s32.totalorder %s1150_s13, %s1146_s12  ;;  %p1494_p1 = scmp.eq.s32.totalorder %s1209_s16, 0 }
   0xa   : > { %p95_p3 = scmp.eq.s32.totalorder %s736_s17, 3  ;;  %p737_p5 = scmp.ge.s32.totalorder %s1158_s15, 1 }
   0xb   : > { %p1218_p4 = por %p1494_p1, %p44_p0  ;;  %p128_p7 = scmp.lt.s32.totalorder %s1158_s15, 5 }
   0xc   : > { %p1223_p6 = por %p95_p3, %p44_p0  ;;  %s1160_s21 = smov [#allocation5]  }
   0xd   : > { %s1497_s18 = scalar_select %p1218_p4, 1, 0 }
   0xe   : > { %s1498_s19 = scalar_select %p1223_p6, 1, 0 }
   0xf   : > { %p1228_p8 = pnand %p737_p5, %p128_p7  ;;  %s140_s22 = sshll.u32 %s1160_s21, 4  ;;  %s141_s22 = int_to_ptr.vmem [resolvable:$true] %s140_s22 }
  0x10   : > { %s1241_s24 = sadd.s32 1, %s1158_s15   ;;  %s31_s25 = sadd.s32 1, %s1154_s14 }
  0x11   : > { %s1499_s20 = scalar_select %p1228_p8, 1, 0 }
  0x12   : > { %p926_p9 = pneg %p1228_p8  ;;  %s28_s26 = ssub.s32 %s1158_s15, %s1241_s24 }
  0x13   : > { %s998_s29 = scalar_lea.hbm %s1491_s1, 1024 }
  0x14   : > { %p1236_p10 = pnand %p926_p9, %p1494_p1  ;;  %p999_p11 = scmp.ne.s32.totalorder %s1491_s1, %s998_s29 }
  0x15   : > { %p1005_p3 = scmp.lt.u32.totalorder %s998_s29, %s1491_s1 }
  0x16   : > { %p1000_p12 = pneg %p1236_p10 }
  0x18   : > { %p1001_p13 = pnand %p1000_p12, %p999_p11 }
  0x1a   : > { %p1002_p0 = pneg %p1001_p13 }
  0x1c   : > { %p1007_p5 = pnand %p1005_p3, %p1002_p0 }
  0x1e   : > { %1010 = shalt.err (!%p1007_p5)
}
  0x1f   : > { %s1011_s7 = scalar_lea.vmem %s141_s22, 1024  ;;  %p1019_p2 = scmp.lt.s32.totalorder %s141_s22, %s141_s22 }
  0x20   : > { %p1012_p7 = scmp.ne.s32.totalorder %s141_s22, %s1011_s7  ;;  %p1020_p6 = scmp.lt.s32.totalorder %s1011_s7, %s1011_s7 }
  0x22   : > { %p1014_p9 = pnand %p1012_p7, %p1000_p12  ;;  %p1021_p4 = por %p1020_p6, %p1019_p2 }
  0x24   : > { %p1015_p1 = pneg %p1014_p9 }
  0x26   : > { %p1022_p8 = pnand %p1021_p4, %p1015_p1 }
  0x28   : > { %1025 = shalt.err (!%p1022_p8)
}
  0x29   : > { %s1161_s8 = smov 64   ;;  %s1162_s9 = smov 4  }
  0x2a   : > { %929 = dma.hbm_to_vmem [thread:$0]  (!%p1236_p10), %s1491_s1, 1024, %s141_s22, [#allocation6], %s1161_s8, %s1161_s8, %s1162_s9  }
  0x2b   : > { %p29_p1 = scmp.eq.s32.totalorder %s28_s26, 0  ;;  %p38_p2 = scmp.ne.s32.totalorder %s1154_s14, %s1150_s13 }
  0x2c   : > { %p39_p4 = scmp.eq.s32.totalorder %s1158_s15, 0  ;;  %p942_p6 = scmp.lt.s32.totalorder %s1158_s15, 4 }
  0x2d   : > { %s1270_s17 = scalar_select %p29_p1, %s1154_s14, %s31_s25  }
  0x2e   : > { %p40_p8 = por %p39_p4, %p38_p2  ;;  %p1501_p11 = scmp.eq.s32.totalorder %s1209_s16, 3 }
  0x2f   : > { %s154_s23 = sand.u32 1, %s1154_s14   ;;  %s787_s27 = sshll.u32 %s1158_s15, 10 }
  0x30   : > { %p1274_p12 = por %p1501_p11, %p38_p2  ;;  %s740_s28 = sshll.u32 %s154_s23, 6 }
  0x31   : > { %s1283_s4 = scalar_lea.hbm %s1490_s0, %s787_s27  ;;  %s158_s22 = scalar_lea.vmem [#allocation2], %s740_s28 }
  0x32   : > { %s165_s25 = sshll.u32 %s158_s22, 4  ;;  %p1285_p10 = pnand %p942_p6, %p40_p8  ;;  %s1289_s25 = int_to_ptr.vmem [resolvable:$true] %s165_s25 }
  0x33   : > { %s1291_s5 = scalar_lea.sflag [#allocation3], %s154_s23  ;;  %s1026_s6 = scalar_lea.hbm %s1283_s4, 1024 }
  0x34   : > { %p1027_p13 = scmp.ne.s32.totalorder %s1283_s4, %s1026_s6  ;;  %p1028_p0 = pneg %p1285_p10 }
  0x35   : > { %s1031_s11 = scalar_lea.hbm %s1490_s0, 4096  ;;  %p1032_p7 = scmp.lt.u32.totalorder %s1283_s4, %s1490_s0 }
  0x36   : > { %p1029_p3 = pnand %p1028_p0, %p1027_p13  ;;  %p1033_p9 = scmp.lt.u32.totalorder %s1031_s11, %s1026_s6 }
  0x37   : > { %p1035_p2 = scmp.lt.u32.totalorder %s1026_s6, %s1283_s4 }
  0x38   : > { %p1030_p5 = pneg %p1029_p3  ;;  %p1034_p1 = por %p1033_p9, %p1032_p7 }
  0x3a   : > { %p1036_p4 = por %p1035_p2, %p1034_p1 }
  0x3c   : > { %p1037_p6 = pnand %p1036_p4, %p1030_p5 }
  0x3e   : > { %1040 = shalt.err (!%p1037_p6)
}
  0x3f   : > { %s1041_s23 = scalar_lea.vmem %s1289_s25, 1024  ;;  %s1163_s29 = smov [#allocation2]  }
  0x40   : > { %p1042_p8 = scmp.ne.s32.totalorder %s1289_s25, %s1041_s23  ;;  %s1046_s30 = sshll.u32 %s1163_s29, 4  ;;  %s1047_s30 = int_to_ptr.vmem [resolvable:$false] %s1046_s30 }
  0x41   : > { %s1048_s22 = scalar_lea.vmem %s1047_s30, 2048  ;;  %p1049_p3 = scmp.lt.s32.totalorder %s1289_s25, %s1047_s30 }
  0x42   : > { %p1044_p11 = pnand %p1042_p8, %p1028_p0  ;;  %p1050_p7 = scmp.lt.s32.totalorder %s1048_s22, %s1041_s23 }
  0x44   : > { %p1045_p13 = pneg %p1044_p11  ;;  %p1051_p9 = por %p1050_p7, %p1049_p3 }
  0x46   : > { %p1052_p1 = pnand %p1051_p9, %p1045_p13 }
  0x48   : > { %1055 = shalt.err (!%p1052_p1)
}
  0x49   : > { %933 = dma.hbm_to_vmem [thread:$0]  (!%p1285_p10), %s1283_s4, 1024, %s1289_s25, %s1291_s5, %s1161_s8, %s1161_s8, %s1162_s9  }
  0x4a   : > { %p1504_p0 = scmp.ne.s32.totalorder %s1499_s20, 0 }
  0x4b   : > { %s1325_s6 = sand.u32 (!%p1504_p0), 1, %s1150_s13   ;;  %p1505_p5 = scmp.ne.s32.totalorder (!%p1504_p0), %s1497_s18, 0 }
  0x4c   : > { %177 = sbr.rel (%p1504_p0) target bundleno = 407 (0x197), region = 28  ;;  %s744_s7 = sshll.u32 (!%p1504_p0), %s1325_s6, 6 }
  0x4d   : > { %s180_s10 = scalar_lea.sflag (!%p1504_p0), [#allocation3], %s1325_s6  ;;  %s1331_s26 = scalar_lea.vmem (!%p1504_p0), [#allocation2], %s744_s7 }
  0x53   : > { %1129 = dma.done.wait (%p1505_p5), %s180_s10, 1024  }
  0x54   : > { %1131 = vsyncadd (%p1505_p5), %s180_s10, 4294966272  ;;  %p1506_p10 = scmp.eq.s32.totalorder %s1209_s16, 0 }
  0x56   : > { %1133 = dma.done.wait (%p1506_p10), [#allocation6], 1024   ;;  %p1507_p2 = pmov %p1506_p10 }
  0x57   : > { %v982_v0 = vld [vmem:[#allocation5] sm:$0xff]   ;;  %v983_v1 = vld [vmem:[#allocation5 + $0x8] sm:$0xff]   ;;  %v984_v2 = vld [vmem:[#allocation5 + $0x10] sm:$0xff]   ;;  %s1363_s18 = scalar_lea.vmem [#allocation7], %s744_s7  ;;  %s804_s8 = sshll.u32 %s1209_s16, 10 }
  0x58   : > { %1135 = vsyncadd (%p1507_p2), [#allocation6], 4294966272  ;;  %868 = vmatprep.subr.bf16.mxu0 %v982_v0  ;;  %900 = vmatprep.subr.bf16.mxu1 %v982_v0  ;;  %v985_v3 = vld [vmem:[#allocation5 + $0x18] sm:$0xff]   ;;  %v990_v4 = vld [vmem:[%s1331_s26] sm:$0xff]   ;;  %s608_s20 = sshll.u32 %s1363_s18, 4  ;;  %s1384_s25 = scalar_lea.hbm %s1492_s2, %s804_s8  ;;  %s1386_s20 = int_to_ptr.vmem [resolvable:$true] %s608_s20 }
  0x59   : > { %869 = vmatpush3.bf16.msra.mxu0 %v982_v0  ;;  %908 = vmatpush3.bf16.msra.mxu1 %v982_v0  ;;  %v986_v5 = vld [vmem:[#allocation5 + $0x20] sm:$0xff]   ;;  %v987_v7 = vld [vmem:[#allocation5 + $0x28] sm:$0xff]   ;;  %v988_v8 = vld [vmem:[#allocation5 + $0x30] sm:$0xff]   ;;  %s590_s5 = scalar_lea.sflag [#allocation4], %s1325_s6  ;;  %s1056_s11 = scalar_lea.vmem %s1386_s20, 1024 }
  0x5a   : > { %870 = vmatprep.subr.bf16.mxu0 %v983_v1  ;;  %901 = vmatprep.subr.bf16.mxu1 %v983_v1  ;;  %v994_v6 = vld [vmem:[%s1331_s26 + $0x20] sm:$0xff]   ;;  %v989_v9 = vld [vmem:[#allocation5 + $0x38] sm:$0xff]   ;;  %v991_v10 = vld [vmem:[%s1331_s26 + $0x8] sm:$0xff]   ;;  %p1057_p4 = scmp.ne.s32.totalorder %s1386_s20, %s1056_s11  ;;  %s1164_s27 = smov [#allocation7]  }
  0x5b   : > { %884 = vmatprep.mubr.bf16.mxu0 %v990_v4  ;;  %892 = vmatprep.mubr.bf16.mxu1 %v994_v6  ;;  %v995_v11 = vld [vmem:[%s1331_s26 + $0x28] sm:$0xff]   ;;  %v992_v12 = vld [vmem:[%s1331_s26 + $0x10] sm:$0xff]   ;;  %v993_v14 = vld [vmem:[%s1331_s26 + $0x18] sm:$0xff]   ;;  %s1060_s28 = sshll.u32 %s1164_s27, 4  ;;  %s1061_s28 = int_to_ptr.vmem [resolvable:$false] %s1060_s28 }
  0x5c   : > { %v996_v13 = vld [vmem:[%s1331_s26 + $0x30] sm:$0xff]   ;;  %v997_v15 = vld [vmem:[%s1331_s26 + $0x38] sm:$0xff]   ;;  %p1058_p6 = pnand %p1057_p4, %p1274_p12  ;;  %s1062_s23 = scalar_lea.vmem %s1061_s28, 2048 }
  0x5d   : > { %871 = vmatpush3.bf16.msra.mxu0 %v983_v1  ;;  %909 = vmatpush3.bf16.msra.mxu1 %v983_v1  ;;  %p1063_p11 = scmp.lt.s32.totalorder %s1386_s20, %s1061_s28  ;;  %p1064_p13 = scmp.lt.s32.totalorder %s1062_s23, %s1056_s11 }
  0x5e   : > { %872 = vmatprep.subr.bf16.mxu0 %v984_v2  ;;  %902 = vmatprep.subr.bf16.mxu1 %v984_v2  ;;  %p1059_p8 = pneg %p1058_p6 }
  0x5f   : > { %p1065_p3 = por %p1064_p13, %p1063_p11 }
  0x61   : > { %873 = vmatpush3.bf16.msra.mxu0 %v984_v2  ;;  %910 = vmatpush3.bf16.msra.mxu1 %v984_v2  ;;  %p1066_p7 = pnand %p1065_p3, %p1059_p8 }
  0x62   : > { %874 = vmatprep.subr.bf16.mxu0 %v985_v3  ;;  %903 = vmatprep.subr.bf16.mxu1 %v985_v3 }
  0x65   : > { %875 = vmatpush3.bf16.msra.mxu0 %v985_v3  ;;  %911 = vmatpush3.bf16.msra.mxu1 %v985_v3 }
  0x66   : > { %876 = vmatprep.subr.bf16.mxu0 %v986_v5  ;;  %904 = vmatprep.subr.bf16.mxu1 %v986_v5 }
  0x69   : > { %877 = vmatpush3.bf16.msra.mxu0 %v986_v5  ;;  %912 = vmatpush3.bf16.msra.mxu1 %v986_v5 }
  0x6a   : > { %878 = vmatprep.subr.bf16.mxu0 %v987_v7  ;;  %905 = vmatprep.subr.bf16.mxu1 %v987_v7 }
  0x6d   : > { %879 = vmatpush3.bf16.msra.mxu0 %v987_v7  ;;  %913 = vmatpush3.bf16.msra.mxu1 %v987_v7 }
  0x6e   : > { %880 = vmatprep.subr.bf16.mxu0 %v988_v8  ;;  %906 = vmatprep.subr.bf16.mxu1 %v988_v8 }
  0x71   : > { %881 = vmatpush3.bf16.msra.mxu0 %v988_v8  ;;  %914 = vmatpush3.bf16.msra.mxu1 %v988_v8 }
  0x72   : > { %882 = vmatprep.subr.bf16.mxu0 %v989_v9  ;;  %907 = vmatprep.subr.bf16.mxu1 %v989_v9 }
  0x75   : > { %883 = vmatpush3.bf16.msra.mxu0 %v989_v9  ;;  %915 = vmatpush3.bf16.msra.mxu1 %v989_v9 }
  0x78   : > { %885 = vmatmul.mubr.bf16.vlgmr.msra.gmra.mrb[0].mxu0 %v991_v10  ;;  %893 = vmatmul.mubr.bf16.vlgmr.msra.gmra.mrb[0].mxu1 %v995_v11 }
  0x79   : > { %888 = vmatprep.mubr.bf16.mxu0 %v992_v12  ;;  %896 = vmatprep.mubr.bf16.mxu1 %v996_v13 }
  0x80   : > { %889 = vmatmul.mubr.bf16.gmra.mrb[4].mxu0 %v993_v14  ;;  %897 = vmatmul.mubr.bf16.gmra.mrb[4].mxu1 %v997_v15 }
 0x14b   : > { %v886_v16 = vpop.f32.mrb[0].mxu0  ;;  %v1349_v17 = vpop.f32.mrb[0].mxu1 }
 0x14c   : > { %v380_v18 = vpop.f32.mrb[1].mxu0  ;;  %v1351_v19 = vpop.f32.mrb[1].mxu1  ;;  %v546_v31 = vmul.f32 %v886_v16, %v886_v16 }
 0x14d   : > { %v887_v20 = vpop.f32.mrb[2].mxu0  ;;  %v1353_v21 = vpop.f32.mrb[2].mxu1  ;;  %v544_v22 = vmul.f32 %v380_v18, %v380_v18  ;;  %v552_v61 = vmul.f32 %v1351_v19, %v1351_v19 }
 0x14e   : > { %v813_v23 = vpack.c.bf16 %v887_v20, %v886_v16  ;;  %v383_v24 = vpop.f32.mrb[3].mxu0  ;;  %v833_v25 = vpack.c.bf16 %v1353_v21, %v1349_v17  ;;  %v1357_v26 = vpop.f32.mrb[3].mxu1  ;;  %v547_v34 = vmul.f32 %v887_v20, %v887_v20 }
 0x14f   : > { %v808_v27 = vpack.c.bf16 %v383_v24, %v380_v18  ;;  %v523_v28 = vadd.f32 %v383_v24, %v380_v18  ;;  %v545_v29 = vmul.f32 %v383_v24, %v383_v24  ;;  %v828_v30 = vpack.c.bf16 %v1357_v26, %v1351_v19 }
 0x150   : > { %845 = vst [vmem:[%s1363_s18 + $0x8] sm:$0xff] %v813_v23   ;;  %849 = vst [vmem:[%s1363_s18 + $0x28] sm:$0xff] %v833_v25  }
 0x151   : > { %809 = vst [vmem:[%s1363_s18] sm:$0xff] %v808_v27   ;;  %v524_v32 = vadd.f32 %v886_v16, %v523_v28  ;;  %v560_v33 = vadd.f32 %v545_v29, %v544_v22  ;;  %848 = vst [vmem:[%s1363_s18 + $0x20] sm:$0xff] %v828_v30  }
 0x153   : > { %v561_v35 = vadd.f32 %v560_v33, %v546_v31  ;;  %v890_v36 = vpop.f32.mrb[4].mxu0  ;;  %v525_v37 = vadd.f32 %v887_v20, %v524_v32  ;;  %v1369_v38 = vpop.f32.mrb[4].mxu1 }
 0x154   : > { %v396_v39 = vpop.f32.mrb[5].mxu0  ;;  %v1372_v40 = vpop.f32.mrb[5].mxu1  ;;  %v550_v55 = vmul.f32 %v890_v36, %v890_v36 }
 0x155   : > { %v526_v41 = vadd.f32 %v525_v37, %v396_v39  ;;  %v548_v42 = vmul.f32 %v396_v39, %v396_v39  ;;  %v562_v43 = vadd.f32 %v561_v35, %v547_v34  ;;  %v891_v44 = vpop.f32.mrb[6].mxu0  ;;  %v1375_v45 = vpop.f32.mrb[6].mxu1 }
 0x156   : > { %v823_v46 = vpack.c.bf16 %v891_v44, %v890_v36  ;;  %v399_v47 = vpop.f32.mrb[7].mxu0  ;;  %v843_v48 = vpack.c.bf16 %v1375_v45, %v1369_v38  ;;  %v1379_v49 = vpop.f32.mrb[7].mxu1  ;;  %v551_v58 = vmul.f32 %v891_v44, %v891_v44 }
 0x157   : > { %v563_v50 = vadd.f32 %v562_v43, %v548_v42  ;;  %v818_v51 = vpack.c.bf16 %v399_v47, %v396_v39  ;;  %v527_v52 = vadd.f32 %v526_v41, %v399_v47  ;;  %v549_v53 = vmul.f32 %v399_v47, %v399_v47 }
 0x158   : > { %847 = vst [vmem:[%s1363_s18 + $0x18] sm:$0xff] %v823_v46   ;;  %851 = vst [vmem:[%s1363_s18 + $0x38] sm:$0xff] %v843_v48   ;;  %v838_v54 = vpack.c.bf16 %v1379_v49, %v1372_v40 }
 0x159   : > { %846 = vst [vmem:[%s1363_s18 + $0x10] sm:$0xff] %v818_v51   ;;  %v528_v56 = vadd.f32 %v890_v36, %v527_v52  ;;  %v564_v57 = vadd.f32 %v563_v50, %v549_v53 }
 0x15a   : > { %850 = vst [vmem:[%s1363_s18 + $0x30] sm:$0xff] %v838_v54  }
 0x15b   : > { %v565_v59 = vadd.f32 %v564_v57, %v550_v55  ;;  %v529_v60 = vadd.f32 %v891_v44, %v528_v56 }
 0x15c   : > { %1069 = shalt.err (!%p1066_p7)
}
 0x15d   : > { %s1070_s29 = scalar_lea.hbm %s1384_s25, 1024  ;;  %s1074_s7 = scalar_lea.hbm %s1492_s2, 4096 }
 0x15e   : > { %p1071_p9 = scmp.ne.s32.totalorder %s1384_s25, %s1070_s29  ;;  %p1075_p5 = scmp.lt.u32.totalorder %s1384_s25, %s1492_s2 }
 0x15f   : > { %p1076_p10 = scmp.lt.u32.totalorder %s1074_s7, %s1070_s29  ;;  %p1078_p4 = scmp.lt.u32.totalorder %s1070_s29, %s1384_s25 }
 0x160   : > { %p1072_p1 = pnand %p1071_p9, %p1274_p12 }
 0x161   : > { %p1077_p2 = por %p1076_p10, %p1075_p5 }
 0x162   : > { %p1073_p0 = pneg %p1072_p1 }
 0x163   : > { %p1079_p6 = por %p1078_p4, %p1077_p2 }
 0x165   : > { %p1080_p8 = pnand %p1079_p6, %p1073_p0 }
 0x167   : > { %1083 = shalt.err (!%p1080_p8)
}
 0x168   : > { %s1165_s18 = smov 64   ;;  %s1166_s8 = smov 4   ;;  %v530_v62 = vadd.f32 %v529_v60, %v1351_v19  ;;  %v566_v63 = vadd.f32 %v565_v59, %v551_v58  ;;  %v553_v2 = vmul.f32 %v1357_v26, %v1357_v26  ;;  %v554_v3 = vmul.f32 %v1349_v17, %v1349_v17 }
 0x169   : > { %922 = dma.vmem_to_hbm [thread:$0]  (%p1274_p12), %s1386_s20, 1024, %s1384_s25, %s590_s5, %s1165_s18, %s1165_s18, %s1166_s8   ;;  %v555_v6 = vmul.f32 %v1353_v21, %v1353_v21  ;;  %v556_v9 = vmul.f32 %v1372_v40, %v1372_v40  ;;  %v557_v14 = vmul.f32 %v1379_v49, %v1379_v49  ;;  %v558_v15 = vmul.f32 %v1369_v38, %v1369_v38 }
 0x16a   : > { %v567_v0 = vadd.f32 %v566_v63, %v552_v61  ;;  %v531_v1 = vadd.f32 %v530_v62, %v1357_v26  ;;  %v559_v18 = vmul.f32 %v1375_v45, %v1375_v45  ;;  %v581_v25 = vlaneseq  ;;  %s747_s20 = sshll.u32 %s1325_s6, 3  ;;  %s784_s9 = sshll.u32 %s1209_s16, 7 }
 0x16b   : > { %s214_s4 = scalar_lea.vmem [#allocation8], %s747_s20  ;;  %s1447_s27 = scalar_lea.hbm %s1493_s3, %s784_s9 }
 0x16c   : > { %v532_v4 = vadd.f32 %v1349_v17, %v531_v1  ;;  %v568_v5 = vadd.f32 %v567_v0, %v553_v2  ;;  %v582_v30 = vshrl.u32 %v581_v25, 7  ;;  %s624_s25 = sshll.u32 %s214_s4, 4  ;;  %s595_s28 = scalar_lea.sflag [#allocation9], %s1325_s6  ;;  %s1449_s25 = int_to_ptr.vmem [resolvable:$true] %s624_s25 }
 0x16d   : > { %s1084_s23 = scalar_lea.vmem %s1449_s25, 128  ;;  %s1167_s16 = smov [#allocation8]  }
 0x16e   : > { %v569_v7 = vadd.f32 %v568_v5, %v554_v3  ;;  %v533_v8 = vadd.f32 %v1353_v21, %v532_v4  ;;  %vm583_vm0 = vcmp.eq.s32.totalorder %v582_v30, 0  ;;  %vm585_vm1 = vcmp.eq.s32.totalorder %v582_v30, 1  ;;  %p1085_p11 = scmp.ne.s32.totalorder %s1449_s25, %s1084_s23  ;;  %s1088_s29 = sshll.u32 %s1167_s16, 4  ;;  %s1089_s29 = int_to_ptr.vmem [resolvable:$false] %s1088_s29 }
 0x16f   : > { %s1090_s30 = scalar_lea.vmem %s1089_s29, 256  ;;  %p1091_p7 = scmp.lt.s32.totalorder %s1449_s25, %s1089_s29 }
 0x170   : > { %v534_v10 = vadd.f32 %v533_v8, %v1372_v40  ;;  %v570_v11 = vadd.f32 %v569_v7, %v555_v6  ;;  %p1086_p13 = pnand %p1085_p11, %p1274_p12  ;;  %p1092_p9 = scmp.lt.s32.totalorder %s1090_s30, %s1084_s23 }
 0x172   : > { %v571_v12 = vadd.f32 %v570_v11, %v556_v9  ;;  %v535_v13 = vadd.f32 %v534_v10, %v1379_v49  ;;  %p1087_p3 = pneg %p1086_p13  ;;  %p1093_p1 = por %p1092_p9, %p1091_p7 }
 0x174   : > { %v536_v16 = vadd.f32 %v1369_v38, %v535_v13  ;;  %v572_v17 = vadd.f32 %v571_v12, %v557_v14  ;;  %p1094_p0 = pnand %p1093_p1, %p1087_p3 }
 0x176   : > { %v537_v19 = vadd.f32 %v1375_v45, %v536_v16  ;;  %v573_v20 = vadd.f32 %v572_v17, %v558_v15 }
 0x178   : > { %v538_v21 = vrot.slane %v537_v19, 4  ;;  %v574_v22 = vadd.f32 %v573_v20, %v559_v18 }
 0x17a   : > { %v539_v23 = vadd.f32 %v538_v21, %v537_v19  ;;  %v575_v24 = vrot.slane %v574_v22, 4 }
 0x17c   : > { %v540_v26 = vrot.slane %v539_v23, 2  ;;  %v576_v27 = vadd.f32 %v575_v24, %v574_v22 }
 0x17e   : > { %v541_v28 = vadd.f32 %v540_v26, %v539_v23  ;;  %v577_v29 = vrot.slane %v576_v27, 2 }
 0x180   : > { %v542_v31 = vrot.slane %v541_v28, 1  ;;  %v578_v32 = vadd.f32 %v577_v29, %v576_v27 }
 0x182   : > { %v543_v33 = vadd.f32 %v542_v31, %v541_v28  ;;  %v579_v34 = vrot.slane %v578_v32, 1 }
 0x184   : > { %v580_v35 = vadd.f32 %v579_v34, %v578_v32  ;;  %v584_v36 = vsel %vm583_vm0, %v543_v33, 0.0 }
 0x186   : > { %v586_v37 = vsel %vm585_vm1, %v580_v35, 0.0 }
 0x187   : > { %v587_v38 = vadd.f32 %v586_v37, %v584_v36 }
 0x189   : > { %588 = vst [vmem:[%s214_s4] sm:$0xff] %v587_v38 }
 0x18a   : > { %1097 = shalt.err (!%p1094_p0)
}
 0x18b   : > { %s1098_s6 = scalar_lea.hbm %s1447_s27, 128  ;;  %s1102_s10 = scalar_lea.hbm %s1493_s3, 512 }
 0x18c   : > { %p1099_p5 = scmp.ne.s32.totalorder %s1447_s27, %s1098_s6  ;;  %p1103_p4 = scmp.lt.u32.totalorder %s1447_s27, %s1493_s3 }
 0x18d   : > { %p1104_p6 = scmp.lt.u32.totalorder %s1102_s10, %s1098_s6  ;;  %p1106_p11 = scmp.lt.u32.totalorder %s1098_s6, %s1447_s27 }
 0x18e   : > { %p1100_p10 = pnand %p1099_p5, %p1274_p12 }
 0x18f   : > { %p1105_p8 = por %p1104_p6, %p1103_p4 }
 0x190   : > { %p1101_p2 = pneg %p1100_p10 }
 0x191   : > { %p1107_p13 = por %p1106_p11, %p1105_p8 }
 0x193   : > { %p1108_p3 = pnand %p1107_p13, %p1101_p2 }
 0x195   : > { %1111 = shalt.err (!%p1108_p3)
}
 0x196   : > { %923 = dma.vmem_to_hbm [thread:$0]  (%p1274_p12), %s1449_s25, 128, %s1447_s27, %s595_s28  }
 0x197 PF: > { %p944_p7 = scmp.ge.s32.totalorder %s1158_s15, 2  ;;  %s636_s8 = sand.u32 1, %s1146_s12  }
 0x198   : > { %p1508_p9 = scmp.ne.s32.totalorder %s1498_s19, 0  ;;  %s637_s20 = scalar_lea.sflag [#allocation4], %s636_s8 }
 0x19a   : > { %p935_p1 = pnand %p944_p7, %p1508_p9 }
 0x19c   : > { %1137 = dma.done.wait (!%p935_p1), %s637_s20, 1024  }
 0x19d   : > { %1139 = vsyncadd (!%p935_p1), %s637_s20, 4294966272  ;;  %s646_s9 = scalar_lea.sflag [#allocation9], %s636_s8 }
 0x19e   : > { %1141 = dma.done.wait (!%p935_p1), %s646_s9, 128  }
 0x19f   : > { %1143 = vsyncadd (!%p935_p1), %s646_s9, 4294967168  ;;  %p21_p12 = scmp.ge.s32.totalorder %s1241_s24, 6   ;;  %s1509_s12 = smov %s1150_s13 }
 0x1a0   : > { %s1510_s13 = smov %s1154_s14  ;;  %s1511_s14 = smov %s1270_s17 }
 0x1a1   : > { %s1512_s15 = smov %s1241_s24  ;;  %23 = sbr.rel (!%p21_p12) target bundleno = 8 (0x8), region = 94 }
 0x1a8   :  { %651 = vsyncpa [#allocation3], 1 }
 0x1a9   :  { %653 = vsyncpa [#allocation3 + $0x1], 1 }
 0x1aa   :  { %654 = vsyncpa [#allocation6], 1 }
 0x1ab   :  { %655 = vsyncpa [#allocation4], 1 }
 0x1ac   :  { %657 = vsyncpa [#allocation4 + $0x1], 1 }
 0x1ad   :  { %658 = vsyncpa [#allocation9], 1 }
 0x1ae   :  { %660 = vsyncpa [#allocation9 + $0x1], 1 }

// kernel: _lambda_.7
= control target key start
LH: loop header
LB: loop body
LE: loop exit
PB: predicated region body
PF: predicated region fallthrough
CT: control target
= control target key end

     0   :  { %8 = vsyncpa [#allocation3], 0  ;;  %s1046_s0 = inlined_call_operand.hbm [shape: bf16[512,128], index: 0, kind: input, shape index: {}]   ;;  %s1047_s1 = inlined_call_operand.hbm [shape: f32[1,128], index: 1, kind: input, shape index: {}]   ;;  %s1048_s2 = inlined_call_operand.hbm [shape: f32[1,128], index: 2, kind: input, shape index: {}]   ;;  %s1049_s3 = inlined_call_operand.hbm [shape: f32[512,128], index: 3, kind: output, shape index: {}]  }
   0x1   :  { %10 = vsyncpa [#allocation3 + $0x1], 0 }
   0x2   :  { %11 = vsyncpa [#allocation6], 0 }
   0x3   :  { %12 = vsyncpa [#allocation4], 0 }
   0x4   :  { %14 = vsyncpa [#allocation4 + $0x1], 0  ;;  %s750_s12 = smov 0   ;;  %s752_s13 = smov 0  }
   0x5   :  { %s754_s14 = smov 0   ;;  %s756_s15 = smov 0  }
   0x6 LB: > { %s771_s16 = sadd.s32 4294967295, %s720_s15   ;;  %s432_s17 = sadd.s32 4294967294, %s720_s15   ;;  %s720_s15 = sphi %s756_s15, %s1072_s15   ;;  %s716_s14 = sphi %s754_s14, %s1071_s14   ;;  %s712_s13 = sphi %s752_s13, %s1070_s13   ;;  %s708_s12 = sphi %s750_s12, %s1069_s12  }
   0x7   : > { %s775_s18 = sadd.s32 1, %s720_s15   ;;  %s27_s19 = sadd.s32 1, %s716_s14 }
   0x8   : > { %s24_s20 = ssub.s32 %s720_s15, %s775_s18  ;;  %p34_p0 = scmp.ne.s32.totalorder %s716_s14, %s712_s13 }
   0x9   : > { %p25_p1 = scmp.eq.s32.totalorder %s24_s20, 0  ;;  %p35_p2 = scmp.eq.s32.totalorder %s720_s15, 0 }
   0xa   : > { %p40_p3 = scmp.ne.s32.totalorder %s712_s13, %s708_s12  ;;  %p1050_p4 = scmp.eq.s32.totalorder %s771_s16, 0 }
   0xb   : > { %s787_s21 = scalar_select %p25_p1, %s716_s14, %s27_s19  }
   0xc   : > { %p789_p5 = por %p35_p2, %p34_p0  ;;  %p795_p6 = por %p1050_p4, %p40_p3 }
   0xd   : > { %p106_p7 = scmp.eq.s32.totalorder %s771_s16, 3  ;;  %p112_p8 = scmp.eq.s32.totalorder %s432_s17, 3 }
   0xe   : > { %s1056_s23 = scalar_select %p795_p6, 1, 0 }
   0xf   : > { %p433_p9 = scmp.ge.s32.totalorder %s720_s15, 1  ;;  %p119_p10 = scmp.lt.s32.totalorder %s720_s15, 5 }
  0x10   : > { %p802_p11 = por %p106_p7, %p34_p0  ;;  %p806_p12 = por %p112_p8, %p40_p3 }
  0x11   : > { %p810_p13 = pnand %p433_p9, %p119_p10  ;;  %s722_s27 = smov [#allocation5]  }
  0x12   : > { %s1057_s24 = scalar_select %p802_p11, 1, 0 }
  0x13   : > { %s1058_s25 = scalar_select %p806_p12, 1, 0 }
  0x14   : > { %s1059_s26 = scalar_select %p810_p13, 1, 0 }
  0x15   : > { %p505_p1 = pneg %p810_p13  ;;  %s132_s28 = sshll.u32 %s722_s27, 4  ;;  %s133_s28 = int_to_ptr.vmem [resolvable:$true] %s132_s28 }
  0x16   : > { %p522_p2 = scmp.lt.s32.totalorder %s720_s15, 4  ;;  %s723_s4 = smov [#allocation7]  }
  0x17   : > { %p819_p0 = pnand %p505_p1, %p1050_p4  ;;  %s143_s5 = sshll.u32 %s723_s4, 4  ;;  %s829_s5 = int_to_ptr.vmem [resolvable:$true] %s143_s5 }
  0x18   : > { %p825_p3 = pnand %p522_p2, %p789_p5  ;;  %s564_s8 = scalar_lea.hbm %s1047_s1, 16 }
  0x19   : > { %p565_p7 = scmp.ne.s32.totalorder %s1047_s1, %s564_s8  ;;  %p566_p8 = pneg %p819_p0 }
  0x1a   : > { %s1061_s30 = scalar_select %p825_p3, 1, 0 }
  0x1b   : > { %p567_p5 = pnand %p566_p8, %p565_p7  ;;  %p571_p10 = scmp.lt.u32.totalorder %s564_s8, %s1047_s1 }
  0x1d   : > { %p568_p9 = pneg %p567_p5 }
  0x1f   : > { %p573_p1 = pnand %p571_p10, %p568_p9 }
  0x21   : > { %576 = shalt.err (!%p573_p1)
}
  0x22   : > { %s577_s19 = scalar_lea.vmem %s133_s28, 16  ;;  %s584_s20 = scalar_lea.vmem %s133_s28, 32 }
  0x23   : > { %p578_p2 = scmp.ne.s32.totalorder %s133_s28, %s577_s19  ;;  %p585_p11 = scmp.lt.s32.totalorder %s133_s28, %s133_s28 }
  0x24   : > { %p586_p6 = scmp.lt.s32.totalorder %s584_s20, %s577_s19 }
  0x25   : > { %p580_p4 = pnand %p578_p2, %p566_p8 }
  0x26   : > { %p587_p13 = por %p586_p6, %p585_p11 }
  0x27   : > { %p581_p12 = pneg %p580_p4 }
  0x29   : > { %p588_p3 = pnand %p587_p13, %p581_p12 }
  0x2b   : > { %591 = shalt.err (!%p588_p3)
}
  0x2c   : > { %508 = dma.hbm_to_vmem [thread:$0]  (!%p819_p0), %s1047_s1, 16, %s133_s28, [#allocation6]  }
  0x2d   : > { %s154_s4 = sand.u32 1, %s716_s14   ;;  %s592_s8 = scalar_lea.hbm %s1048_s2, 16 }
  0x2e   : > { %p593_p4 = scmp.ne.s32.totalorder %s1048_s2, %s592_s8  ;;  %p599_p12 = scmp.lt.u32.totalorder %s592_s8, %s1048_s2 }
  0x30   : > { %p595_p6 = pnand %p593_p4, %p566_p8 }
  0x32   : > { %p596_p11 = pneg %p595_p6 }
  0x34   : > { %p601_p13 = pnand %p599_p12, %p596_p11 }
  0x36   : > { %604 = shalt.err (!%p601_p13)
}
  0x37   : > { %s605_s28 = scalar_lea.vmem %s829_s5, 16  ;;  %s612_s19 = scalar_lea.vmem %s829_s5, 32 }
  0x38   : > { %p606_p3 = scmp.ne.s32.totalorder %s829_s5, %s605_s28  ;;  %p613_p9 = scmp.lt.s32.totalorder %s829_s5, %s829_s5 }
  0x39   : > { %p614_p10 = scmp.lt.s32.totalorder %s612_s19, %s605_s28 }
  0x3a   : > { %p608_p7 = pnand %p606_p3, %p566_p8 }
  0x3b   : > { %p615_p1 = por %p614_p10, %p613_p9 }
  0x3c   : > { %p609_p5 = pneg %p608_p7 }
  0x3e   : > { %p616_p2 = pnand %p615_p1, %p609_p5 }
  0x40   : > { %619 = shalt.err (!%p616_p2)
}
  0x41   : > { %511 = dma.hbm_to_vmem [thread:$0]  (!%p819_p0), %s1048_s2, 16, %s829_s5, [#allocation6]  }
  0x42   : > { %s437_s27 = sshll.u32 %s154_s4, 6  ;;  %s452_s6 = sshll.u32 %s720_s15, 10 }
  0x43   : > { %s884_s9 = scalar_lea.hbm %s1046_s0, %s452_s6  ;;  %s158_s29 = scalar_lea.vmem [#allocation2], %s437_s27 }
  0x44   : > { %s165_s10 = sshll.u32 %s158_s29, 4  ;;  %s888_s11 = scalar_lea.sflag [#allocation3], %s154_s4  ;;  %s886_s10 = int_to_ptr.vmem [resolvable:$true] %s165_s10 }
  0x45   : > { %s620_s17 = scalar_lea.hbm %s884_s9, 1024  ;;  %p1062_p0 = scmp.ne.s32.totalorder %s1061_s30, 0 }
  0x46   : > { %p621_p8 = scmp.ne.s32.totalorder %s884_s9, %s620_s17  ;;  %s625_s19 = scalar_lea.hbm %s1046_s0, 4096 }
  0x47   : > { %p622_p4 = pneg %p1062_p0  ;;  %p626_p12 = scmp.lt.u32.totalorder %s884_s9, %s1046_s0 }
  0x48   : > { %p627_p13 = scmp.lt.u32.totalorder %s625_s19, %s620_s17  ;;  %p629_p7 = scmp.lt.u32.totalorder %s620_s17, %s884_s9 }
  0x49   : > { %p623_p6 = pnand %p622_p4, %p621_p8 }
  0x4a   : > { %p628_p3 = por %p627_p13, %p626_p12 }
  0x4b   : > { %p624_p11 = pneg %p623_p6 }
  0x4c   : > { %p630_p5 = por %p629_p7, %p628_p3 }
  0x4e   : > { %p631_p9 = pnand %p630_p5, %p624_p11 }
  0x50   : > { %634 = shalt.err (!%p631_p9)
}
  0x51   : > { %s635_s4 = scalar_lea.vmem %s886_s10, 1024  ;;  %s724_s27 = smov [#allocation2]  }
  0x52   : > { %p636_p10 = scmp.ne.s32.totalorder %s886_s10, %s635_s4  ;;  %s640_s6 = sshll.u32 %s724_s27, 4  ;;  %s641_s6 = int_to_ptr.vmem [resolvable:$false] %s640_s6 }
  0x53   : > { %s642_s7 = scalar_lea.vmem %s641_s6, 2048  ;;  %p643_p8 = scmp.lt.s32.totalorder %s886_s10, %s641_s6 }
  0x54   : > { %p638_p1 = pnand %p636_p10, %p622_p4  ;;  %p644_p6 = scmp.lt.s32.totalorder %s642_s7, %s635_s4 }
  0x56   : > { %p639_p2 = pneg %p638_p1  ;;  %p645_p12 = por %p644_p6, %p643_p8 }
  0x58   : > { %p646_p13 = pnand %p645_p12, %p639_p2 }
  0x5a   : > { %649 = shalt.err (!%p646_p13)
}
  0x5b   : > { %s725_s8 = smov 64   ;;  %s726_s29 = smov 4  }
  0x5c   : > { %515 = dma.hbm_to_vmem [thread:$0]  (!%p1062_p0), %s884_s9, 1024, %s886_s10, %s888_s11, %s725_s8, %s725_s8, %s726_s29  }
  0x5d   : > { %p1063_p4 = scmp.ne.s32.totalorder %s1059_s26, 0 }
  0x5e   : > { %s919_s17 = sand.u32 (!%p1063_p4), 1, %s712_s13   ;;  %p1064_p11 = scmp.ne.s32.totalorder (!%p1063_p4), %s1056_s23, 0 }
  0x5f   : > { %177 = sbr.rel (%p1063_p4) target bundleno = 141 (0x8d), region = 32  ;;  %s441_s5 = sshll.u32 (!%p1063_p4), %s919_s17, 6 }
  0x60   : > { %s180_s28 = scalar_lea.sflag (!%p1063_p4), [#allocation3], %s919_s17  ;;  %s923_s19 = scalar_lea.vmem (!%p1063_p4), [#allocation2], %s441_s5 }
  0x66   : > { %695 = dma.done.wait (%p1064_p11), %s180_s28, 1024  }
  0x67   : > { %697 = vsyncadd (%p1064_p11), %s180_s28, 4294966272  ;;  %p1065_p0 = scmp.eq.s32.totalorder %s771_s16, 0 }
  0x69   : > { %699 = dma.done.wait (%p1065_p0), [#allocation6], 32   ;;  %p1066_p3 = pmov %p1065_p0 }
  0x6a   : > { %v455_v0 = vld [vmem:[%s923_s19] sm:$0xff]   ;;  %v486_v4 = vld [vmem:[%s923_s19 + $0x8] sm:$0xff]   ;;  %v487_v5 = vld [vmem:[%s923_s19 + $0x10] sm:$0xff]   ;;  %s444_s23 = sshll.u32 %s919_s17, 7  ;;  %s453_s30 = sshll.u32 %s771_s16, 11 }
  0x6b   : > { %701 = vsyncadd (%p1066_p3), [#allocation6], 4294967264  ;;  %v934_v1 = vld [vmem:[#allocation5] ss:$0 sm:$0xff]  ;;  %v456_v2 = vunpack.c.l.bf16 %v455_v0  ;;  %v457_v3 = vunpack.c.h.bf16 %v455_v0  ;;  %v488_v6 = vld [vmem:[%s923_s19 + $0x18] sm:$0xff]   ;;  %v460_v8 = vunpack.c.l.bf16 %v486_v4  ;;  %v461_v9 = vunpack.c.h.bf16 %v486_v4  ;;  %s962_s26 = scalar_lea.vmem [#allocation8], %s444_s23  ;;  %s993_s11 = scalar_lea.hbm %s1049_s3, %s453_s30 }
  0x6c   : > { %v939_v7 = vld [vmem:[#allocation7] ss:$0 sm:$0xff]  ;;  %v464_v10 = vunpack.c.l.bf16 %v487_v5  ;;  %v465_v11 = vunpack.c.h.bf16 %v487_v5  ;;  %v468_v14 = vunpack.c.l.bf16 %v488_v6  ;;  %v469_v15 = vunpack.c.h.bf16 %v488_v6  ;;  %v490_v33 = vld [vmem:[%s923_s19 + $0x28] sm:$0xff]   ;;  %v491_v34 = vld [vmem:[%s923_s19 + $0x30] sm:$0xff]   ;;  %s340_s9 = sshll.u32 %s962_s26, 4  ;;  %s327_s20 = scalar_lea.sflag [#allocation4], %s919_s17  ;;  %s995_s9 = int_to_ptr.vmem [resolvable:$true] %s340_s9 }
  0x6d   : > { %v255_v12 = vmul.f32 %v456_v2, %v934_v1  ;;  %v256_v13 = vmul.f32 %v457_v3, %v934_v1  ;;  %v257_v16 = vmul.f32 %v460_v8, %v934_v1  ;;  %v258_v17 = vmul.f32 %v461_v9, %v934_v1  ;;  %v489_v28 = vld [vmem:[%s923_s19 + $0x20] sm:$0xff]   ;;  %v492_v39 = vld [vmem:[%s923_s19 + $0x38] sm:$0xff]   ;;  %s650_s22 = scalar_lea.vmem %s995_s9, 2048  ;;  %p1067_p5 = scmp.ne.s32.totalorder %s1057_s24, 0 }
  0x6e   : > { %v259_v18 = vmul.f32 %v464_v10, %v934_v1  ;;  %v260_v19 = vmul.f32 %v465_v11, %v934_v1  ;;  %v261_v22 = vmul.f32 %v468_v14, %v934_v1  ;;  %v262_v23 = vmul.f32 %v469_v15, %v934_v1  ;;  %p651_p7 = scmp.ne.s32.totalorder %s995_s9, %s650_s22  ;;  %s727_s4 = smov [#allocation8]  }
  0x6f   : > { %v278_v20 = vadd.f32 %v939_v7, %v255_v12  ;;  %v279_v21 = vadd.f32 %v939_v7, %v256_v13  ;;  %v280_v24 = vadd.f32 %v939_v7, %v257_v16  ;;  %v281_v25 = vadd.f32 %v939_v7, %v258_v17  ;;  %s654_s27 = sshll.u32 %s727_s4, 4  ;;  %s655_s27 = int_to_ptr.vmem [resolvable:$false] %s654_s27 }
  0x70   : > { %v282_v26 = vadd.f32 %v939_v7, %v259_v18  ;;  %v283_v27 = vadd.f32 %v939_v7, %v260_v19  ;;  %v284_v31 = vadd.f32 %v939_v7, %v261_v22  ;;  %v285_v32 = vadd.f32 %v939_v7, %v262_v23  ;;  %p652_p9 = pnand %p651_p7, %p1067_p5  ;;  %s656_s6 = scalar_lea.vmem %s655_s27, 4096 }
  0x71   : > { %v294_v29 = vmax.f32 %v278_v20, 0.0  ;;  %v295_v30 = vmax.f32 %v279_v21, 0.0  ;;  %v296_v35 = vmax.f32 %v280_v24, 0.0  ;;  %v297_v36 = vmax.f32 %v281_v25, 0.0  ;;  %p657_p1 = scmp.lt.s32.totalorder %s995_s9, %s655_s27  ;;  %p658_p2 = scmp.lt.s32.totalorder %s656_s6, %s650_s22 }
  0x72   : > { %v298_v37 = vmax.f32 %v282_v26, 0.0  ;;  %v299_v38 = vmax.f32 %v283_v27, 0.0  ;;  %v300_v40 = vmax.f32 %v284_v31, 0.0  ;;  %v301_v41 = vmax.f32 %v285_v32, 0.0  ;;  %p653_p10 = pneg %p652_p9 }
  0x73   : > { %310 = vst [vmem:[%s962_s26] sm:$0xff] %v294_v29  ;;  %311 = vst [vmem:[%s962_s26 + $0x8] sm:$0xff] %v295_v30  ;;  %v472_v42 = vunpack.c.l.bf16 %v489_v28  ;;  %v473_v43 = vunpack.c.h.bf16 %v489_v28  ;;  %v476_v44 = vunpack.c.l.bf16 %v490_v33  ;;  %v477_v45 = vunpack.c.h.bf16 %v490_v33  ;;  %p659_p8 = por %p658_p2, %p657_p1 }
  0x74   : > { %312 = vst [vmem:[%s962_s26 + $0x10] sm:$0xff] %v296_v35  ;;  %313 = vst [vmem:[%s962_s26 + $0x18] sm:$0xff] %v297_v36  ;;  %v480_v46 = vunpack.c.l.bf16 %v491_v34  ;;  %v481_v47 = vunpack.c.h.bf16 %v491_v34  ;;  %v484_v50 = vunpack.c.l.bf16 %v492_v39  ;;  %v485_v51 = vunpack.c.h.bf16 %v492_v39 }
  0x75   : > { %314 = vst [vmem:[%s962_s26 + $0x20] sm:$0xff] %v298_v37  ;;  %315 = vst [vmem:[%s962_s26 + $0x28] sm:$0xff] %v299_v38  ;;  %v263_v48 = vmul.f32 %v472_v42, %v934_v1  ;;  %v264_v49 = vmul.f32 %v473_v43, %v934_v1  ;;  %v265_v52 = vmul.f32 %v476_v44, %v934_v1  ;;  %p660_p6 = pnand %p659_p8, %p653_p10 }
  0x76   : > { %316 = vst [vmem:[%s962_s26 + $0x30] sm:$0xff] %v300_v40  ;;  %317 = vst [vmem:[%s962_s26 + $0x38] sm:$0xff] %v301_v41  ;;  %v266_v53 = vmul.f32 %v477_v45, %v934_v1  ;;  %v267_v54 = vmul.f32 %v480_v46, %v934_v1  ;;  %v268_v55 = vmul.f32 %v481_v47, %v934_v1 }
  0x77   : > { %v286_v56 = vadd.f32 %v939_v7, %v263_v48  ;;  %v287_v57 = vadd.f32 %v939_v7, %v264_v49  ;;  %v269_v58 = vmul.f32 %v484_v50, %v934_v1  ;;  %v270_v59 = vmul.f32 %v485_v51, %v934_v1 }
  0x78   : > { %v288_v60 = vadd.f32 %v939_v7, %v265_v52  ;;  %v289_v61 = vadd.f32 %v939_v7, %v266_v53  ;;  %v290_v62 = vadd.f32 %v939_v7, %v267_v54  ;;  %v291_v63 = vadd.f32 %v939_v7, %v268_v55 }
  0x79   : > { %v302_v0 = vmax.f32 %v286_v56, 0.0  ;;  %v303_v2 = vmax.f32 %v287_v57, 0.0  ;;  %v292_v1 = vadd.f32 %v939_v7, %v269_v58  ;;  %v293_v3 = vadd.f32 %v939_v7, %v270_v59 }
  0x7a   : > { %v304_v4 = vmax.f32 %v288_v60, 0.0  ;;  %v305_v5 = vmax.f32 %v289_v61, 0.0  ;;  %v306_v6 = vmax.f32 %v290_v62, 0.0  ;;  %v307_v8 = vmax.f32 %v291_v63, 0.0 }
  0x7b   : > { %318 = vst [vmem:[%s962_s26 + $0x40] sm:$0xff] %v302_v0  ;;  %319 = vst [vmem:[%s962_s26 + $0x48] sm:$0xff] %v303_v2  ;;  %v308_v9 = vmax.f32 %v292_v1, 0.0  ;;  %v309_v7 = vmax.f32 %v293_v3, 0.0 }
  0x7c   : > { %320 = vst [vmem:[%s962_s26 + $0x50] sm:$0xff] %v304_v4  ;;  %321 = vst [vmem:[%s962_s26 + $0x58] sm:$0xff] %v305_v5 }
  0x7d   : > { %322 = vst [vmem:[%s962_s26 + $0x60] sm:$0xff] %v306_v6  ;;  %323 = vst [vmem:[%s962_s26 + $0x68] sm:$0xff] %v307_v8 }
  0x7e   : > { %324 = vst [vmem:[%s962_s26 + $0x70] sm:$0xff] %v308_v9  ;;  %325 = vst [vmem:[%s962_s26 + $0x78] sm:$0xff] %v309_v7 }
  0x7f   : > { %663 = shalt.err (!%p660_p6)
}
  0x80   : > { %s664_s7 = scalar_lea.hbm %s993_s11, 2048  ;;  %s668_s5 = scalar_lea.hbm %s1049_s3, 8192 }
  0x81   : > { %p665_p12 = scmp.ne.s32.totalorder %s993_s11, %s664_s7  ;;  %p669_p11 = scmp.lt.u32.totalorder %s993_s11, %s1049_s3 }
  0x82   : > { %p670_p0 = scmp.lt.u32.totalorder %s668_s5, %s664_s7  ;;  %p672_p7 = scmp.lt.u32.totalorder %s664_s7, %s993_s11 }
  0x83   : > { %p666_p13 = pnand %p665_p12, %p1067_p5 }
  0x84   : > { %p671_p3 = por %p670_p0, %p669_p11 }
  0x85   : > { %p667_p4 = pneg %p666_p13 }
  0x86   : > { %p673_p9 = por %p672_p7, %p671_p3 }
  0x88   : > { %p674_p10 = pnand %p673_p9, %p667_p4 }
  0x8a   : > { %677 = shalt.err (!%p674_p10)
}
  0x8b   : > { %s728_s23 = smov 128   ;;  %s729_s26 = smov 8  }
  0x8c   : > { %503 = dma.vmem_to_hbm [thread:$0]  (%p1067_p5), %s995_s9, 2048, %s993_s11, %s327_s20, %s728_s23, %s728_s23, %s729_s26  }
  0x8d PF: > { %p525_p1 = scmp.ge.s32.totalorder %s720_s15, 2  ;;  %s355_s30 = sand.u32 1, %s708_s12  }
  0x8e   : > { %p1068_p2 = scmp.ne.s32.totalorder %s1058_s25, 0  ;;  %s356_s16 = scalar_lea.sflag [#allocation4], %s355_s30 }
  0x90   : > { %p517_p8 = pnand %p525_p1, %p1068_p2 }
  0x92   : > { %703 = dma.done.wait (!%p517_p8), %s356_s16, 2048  }
  0x93   : > { %705 = vsyncadd (!%p517_p8), %s356_s16, 4294965248  ;;  %p17_p6 = scmp.ge.s32.totalorder %s775_s18, 6   ;;  %s1069_s12 = smov %s712_s13 }
  0x94   : > { %s1070_s13 = smov %s716_s14  ;;  %s1071_s14 = smov %s787_s21 }
  0x95   : > { %s1072_s15 = smov %s775_s18  ;;  %19 = sbr.rel (!%p17_p6) target bundleno = 6 (0x6), region = 85 }
  0x9c   :  { %361 = vsyncpa [#allocation3], 1 }
  0x9d   :  { %363 = vsyncpa [#allocation3 + $0x1], 1 }
  0x9e   :  { %364 = vsyncpa [#allocation6], 1 }
  0x9f   :  { %365 = vsyncpa [#allocation4], 1 }
  0xa0   :  { %367 = vsyncpa [#allocation4 + $0x1], 1 }

</bundles_post_ra>
